<compile_context>
chip_gen: v7x
topology: tpu7x:2x2x1
jax: 0.10.0
libtpu: 0.0.40
codegen_flags: <defaults>
</compile_context>

<pallas_src>
import functools

import jax
import jax.numpy as jnp
from jax.experimental import pallas as pl
from jax.experimental.pallas import tpu as pltpu


def _cnn_block_kernel(x_ref, w_ref, b_ref, o_ref, *, s_chunk):
    # x_ref: (b_tile, s_tile, E) f32   (E lane-padded to 128 in VMEM)
    # w_ref: (E, F_pad)          bf16  (resident, identical for every step)
    # b_ref: (1, F_pad)          f32
    # o_ref: (b_tile, F_pad)     f32   running-max block, resident across k
    k = pl.program_id(1)
    bt, st, e = x_ref.shape
    f_pad = o_ref.shape[-1]

    w = w_ref[...]                                                # (E, F_pad) bf16

    # Chunked matmul + running max over S: keeps the live f32 intermediate to
    # (bt*s_chunk, F_pad) (~256 KiB) instead of materializing the whole
    # (bt, st, F_pad) block.  Trip count is small and static.
    acc = jnp.full((bt, f_pad), -jnp.inf, dtype=jnp.float32)
    for c in range(st // s_chunk):
        xc = x_ref[:, c * s_chunk:(c + 1) * s_chunk, :]           # (bt, s_chunk, E) f32
        xc = xc.reshape(bt * s_chunk, e).astype(jnp.bfloat16)     # cast in-kernel: no extra HBM pass
        zc = jnp.dot(xc, w, preferred_element_type=jnp.float32)   # one MXU matmul per chunk
        acc = jnp.maximum(acc, jnp.max(zc.reshape(bt, s_chunk, f_pad), axis=1))

    @pl.when(k == 0)
    def _first():
        o_ref[...] = acc

    @pl.when(k > 0)
    def _accumulate():
        o_ref[...] = jnp.maximum(o_ref[...], acc)

    @pl.when(k == pl.num_programs(1) - 1)
    def _finalize():
        # bias-add + ReLU hoisted past the max over S (bias constant over S,
        # ReLU monotone):  max_s relu(xW + b) == relu(max_s(xW) + b)
        o_ref[...] = jnp.maximum(o_ref[...] + b_ref[...], 0.0)

    # TODO(synk): nn.Dropout(p=0.5) is identity at inference; training-mode
    # dropout (pltpu.prng_seed + prng_random_bits mask, 1/(1-p) scale) omitted.


def _divisors_desc(n):
    return [d for d in range(n, 0, -1) if n % d == 0]


def _pick_tiles(B, S, vmem_budget_bytes):
    """Pick (b_tile, s_tile) against a VMEM budget, accounting for lane padding."""
    LANE = 128  # E is lane-padded to 128 in the VMEM x block (12.8x raw for E=10)

    def x_block_bytes(bt, st):
        return bt * st * LANE * 4  # f32, lane-padded, single buffer

    # Batch tile: prefer >=2 grid steps (v7x megacore "parallel" axis) and a
    # sublane-aligned output block (multiple of 8, or the full batch).
    b_cands = [d for d in _divisors_desc(B)
               if d <= max(1, B // 2) and (d % 8 == 0 or d == B)]
    if not b_cands:
        b_cands = [B]  # fallback: single batch grid step (no megacore split)

    # Sequence tile: prefer full S (reduction axis disappears entirely),
    # otherwise a multiple of 8 (sublane-aligned second-to-last dim).
    s_cands = [d for d in _divisors_desc(S) if d == S or d % 8 == 0]

    for st in s_cands:
        for bt in b_cands:
            if 2 * x_block_bytes(bt, st) <= vmem_budget_bytes:  # 2x: double buffering
                return bt, st
    return b_cands[-1], s_cands[-1]


def _pick_s_chunk(b_tile, s_tile, target_rows=512):
    # Keep each chunk's f32 matmul output to ~(target_rows, 128) (~256 KiB) to
    # cap vreg / VMEM-scratch pressure while staying MXU-friendly.
    for d in _divisors_desc(s_tile):
        if b_tile * d <= target_rows:
            return d
    return 1


def cnn_block_forward(x, conv_weight, conv_bias, *, vmem_budget_bytes=24 * 1024 * 1024):
    """Eval-mode CNNBlock forward.

    x: (B, S, E) f32   (the nn.Module unsqueezes a channel dim; the (1, E)
       conv kernel makes the conv a per-position linear map over E).
    conv_weight: (F, 1, 1, E) f32; conv_bias: (F,) f32.  Returns (B, F) f32.
    """
    B, S, E = x.shape
    F_out = conv_weight.shape[0]
    F_pad = ((F_out + 127) // 128) * 128  # lane-dense output (unmasked vst); no over-padding

    # Pack the Conv2d weight once into an (E, F_pad) bf16 matmul operand and the
    # bias into a (1, F_pad) f32 row.  Call this forward under jax.jit so the
    # packing is hoisted/fused instead of re-dispatched per step.
    w2d = jnp.pad(conv_weight.reshape(F_out, E).T,
                  ((0, 0), (0, F_pad - F_out))).astype(jnp.bfloat16)
    b2d = jnp.pad(conv_bias.astype(jnp.float32).reshape(1, F_out),
                  ((0, 0), (0, F_pad - F_out)))

    b_tile, s_tile = _pick_tiles(B, S, vmem_budget_bytes)
    s_chunk = _pick_s_chunk(b_tile, s_tile)
    grid = (B // b_tile, S // s_tile)

    kernel = functools.partial(_cnn_block_kernel, s_chunk=s_chunk)

    out = pl.pallas_call(
        kernel,
        out_shape=jax.ShapeDtypeStruct((B, F_pad), jnp.float32),
        grid_spec=pltpu.PrefetchScalarGridSpec(
            num_scalar_prefetch=0,
            grid=grid,
            in_specs=[
                pl.BlockSpec((b_tile, s_tile, E), lambda i, k: (i, k, 0)),
                pl.BlockSpec((E, F_pad), lambda i, k: (0, 0)),
                pl.BlockSpec((1, F_pad), lambda i, k: (0, 0)),
            ],
            out_specs=pl.BlockSpec((b_tile, F_pad), lambda i, k: (i, 0)),
        ),
        compiler_params=pltpu.CompilerParams(
            dimension_semantics=("parallel", "arbitrary"),
            # Tiles are sized against `vmem_budget_bytes` (default 24 MiB incl.
            # lane padding + double buffering), so a 32 MiB scoped limit is safe
            # on every generation (v7x: 64 MiB total / 32 MiB scoped default;
            # v5e/v6e: 128 MiB -- raise budget AND limit together for bigger tiles).
            vmem_limit_bytes=32 * 1024 * 1024,
        ),
    )(x, w2d, b2d)

    return out[:, :F_out]


def reference_forward(x, conv_weight, conv_bias):
    """Pure-JAX reference mirroring the PyTorch forward (eval mode), with the
    same bf16 rounding of the matmul operands as the kernel."""
    F_out, _, _, E = conv_weight.shape
    w2d = conv_weight.reshape(F_out, E)
    xb = x.astype(jnp.bfloat16).astype(jnp.float32)
    wb = w2d.astype(jnp.bfloat16).astype(jnp.float32)
    y = jnp.einsum("bse,fe->bsf", xb, wb) + conv_bias[None, None, :]
    y = jnp.maximum(y, 0.0)
    return jnp.max(y, axis=1)                      # (B, F)


if __name__ == "__main__":
    # Module defaults: n_filters=40, embedding_dim=10, dropout=0.5 (identity at eval).
    n_filters, embedding_dim = 40, 10
    B, S = 16, 256                                 # grid = (2 parallel, 1) at these shapes

    key = jax.random.PRNGKey(0)
    kx, kw, kb = jax.random.split(key, 3)

    # Deterministic synthetic params (shapes match nn.Conv2d(1, 40, (1, 10))).
    fan_in = 1 * 1 * embedding_dim
    bound = 1.0 / (fan_in ** 0.5)
    conv_weight = jax.random.uniform(
        kw, (n_filters, 1, 1, embedding_dim), jnp.float32, -bound, bound)
    conv_bias = jax.random.uniform(kb, (n_filters,), jnp.float32, -bound, bound)
    x = jax.random.normal(kx, (B, S, embedding_dim), jnp.float32)

    fwd = jax.jit(cnn_block_forward)               # hoists weight/bias packing
    out = jax.block_until_ready(fwd(x, conv_weight, conv_bias))

    ref = reference_forward(x, conv_weight, conv_bias)
    assert out.shape == (B, n_filters), out.shape
    assert jnp.allclose(out, ref, atol=1e-4, rtol=1e-4), "mismatch vs reference"

    print("KERNEL_OK")
</pallas_src>

<mosaic_0001>
module attributes {stable_mosaic.version = 11 : i64} {
  func.func @_cnn_block_kernel(%arg0: i32, %arg1: i32, %arg2: memref<8x256x10xf32, #tpu.memory_space<vmem>>, %arg3: memref<10x128xbf16, #tpu.memory_space<vmem>>, %arg4: memref<1x128xf32, #tpu.memory_space<vmem>>, %arg5: memref<8x128xf32, #tpu.memory_space<vmem>>) attributes {dimension_semantics = [#tpu.dimension_semantics<parallel>, #tpu.dimension_semantics<arbitrary>], iteration_bounds = array<i64: 2, 1>, scalar_prefetch = 0 : i64, scratch_operands = 0 : i64, tpu.core_type = #tpu.core_type<tc>, window_params = [{transform_indices = @transform_0, window_bounds = array<i64: 8, 256, 10>}, {pipeline_mode = #tpu.pipeline_mode<synchronous>, transform_indices = @transform_1, window_bounds = array<i64: 10, 128>}, {pipeline_mode = #tpu.pipeline_mode<synchronous>, transform_indices = @transform_2, window_bounds = array<i64: 1, 128>}, {transform_indices = @transform_3, window_bounds = array<i64: 8, 128>}]} {
    %c0 = arith.constant 0 : index
    %c0_0 = arith.constant 0 : index
    %0 = vector.load %arg3[%c0, %c0_0] : memref<10x128xbf16, #tpu.memory_space<vmem>>, vector<10x128xbf16>
    %cst = arith.constant 0xFF800000 : f32
    %1 = vector.broadcast %cst : f32 to vector<8x128xf32>
    %c0_1 = arith.constant 0 : index
    %c0_2 = arith.constant 0 : index
    %c0_3 = arith.constant 0 : index
    %2 = vector.load %arg2[%c0_1, %c0_2, %c0_3] : memref<8x256x10xf32, #tpu.memory_space<vmem>>, vector<8x64x10xf32>
    %3 = vector.shape_cast %2 : vector<8x64x10xf32> to vector<512x10xf32>
    %4 = arith.truncf %3 : vector<512x10xf32> to vector<512x10xbf16>
    %cst_4 = arith.constant dense<0.000000e+00> : vector<512x128xf32>
    %5 = tpu.matmul %4, %0, %cst_4 {dimension_numbers = #tpu.dot_dimension_numbers<[1], [0], [0], [1], [0, 0, 1, 1], [], []>} : vector<512x10xbf16>, vector<10x128xbf16>, vector<512x128xf32> -> vector<512x128xf32>
    %6 = vector.shape_cast %5 : vector<512x128xf32> to vector<8x64x128xf32>
    %cst_5 = arith.constant dense<0xFF800000> : vector<8x128xf32>
    %7 = vector.multi_reduction <maximumf>, %6, %cst_5 [1] : vector<8x64x128xf32> to vector<8x128xf32>
    %8 = arith.maximumf %1, %7 : vector<8x128xf32>
    %c0_6 = arith.constant 0 : index
    %c64 = arith.constant 64 : index
    %c0_7 = arith.constant 0 : index
    %9 = vector.load %arg2[%c0_6, %c64, %c0_7] : memref<8x256x10xf32, #tpu.memory_space<vmem>>, vector<8x64x10xf32>
    %10 = vector.shape_cast %9 : vector<8x64x10xf32> to vector<512x10xf32>
    %11 = arith.truncf %10 : vector<512x10xf32> to vector<512x10xbf16>
    %cst_8 = arith.constant dense<0.000000e+00> : vector<512x128xf32>
    %12 = tpu.matmul %11, %0, %cst_8 {dimension_numbers = #tpu.dot_dimension_numbers<[1], [0], [0], [1], [0, 0, 1, 1], [], []>} : vector<512x10xbf16>, vector<10x128xbf16>, vector<512x128xf32> -> vector<512x128xf32>
    %13 = vector.shape_cast %12 : vector<512x128xf32> to vector<8x64x128xf32>
    %cst_9 = arith.constant dense<0xFF800000> : vector<8x128xf32>
    %14 = vector.multi_reduction <maximumf>, %13, %cst_9 [1] : vector<8x64x128xf32> to vector<8x128xf32>
    %15 = arith.maximumf %8, %14 : vector<8x128xf32>
    %c0_10 = arith.constant 0 : index
    %c128 = arith.constant 128 : index
    %c0_11 = arith.constant 0 : index
    %16 = vector.load %arg2[%c0_10, %c128, %c0_11] : memref<8x256x10xf32, #tpu.memory_space<vmem>>, vector<8x64x10xf32>
    %17 = vector.shape_cast %16 : vector<8x64x10xf32> to vector<512x10xf32>
    %18 = arith.truncf %17 : vector<512x10xf32> to vector<512x10xbf16>
    %cst_12 = arith.constant dense<0.000000e+00> : vector<512x128xf32>
    %19 = tpu.matmul %18, %0, %cst_12 {dimension_numbers = #tpu.dot_dimension_numbers<[1], [0], [0], [1], [0, 0, 1, 1], [], []>} : vector<512x10xbf16>, vector<10x128xbf16>, vector<512x128xf32> -> vector<512x128xf32>
    %20 = vector.shape_cast %19 : vector<512x128xf32> to vector<8x64x128xf32>
    %cst_13 = arith.constant dense<0xFF800000> : vector<8x128xf32>
    %21 = vector.multi_reduction <maximumf>, %20, %cst_13 [1] : vector<8x64x128xf32> to vector<8x128xf32>
    %22 = arith.maximumf %15, %21 : vector<8x128xf32>
    %c0_14 = arith.constant 0 : index
    %c192 = arith.constant 192 : index
    %c0_15 = arith.constant 0 : index
    %23 = vector.load %arg2[%c0_14, %c192, %c0_15] : memref<8x256x10xf32, #tpu.memory_space<vmem>>, vector<8x64x10xf32>
    %24 = vector.shape_cast %23 : vector<8x64x10xf32> to vector<512x10xf32>
    %25 = arith.truncf %24 : vector<512x10xf32> to vector<512x10xbf16>
    %cst_16 = arith.constant dense<0.000000e+00> : vector<512x128xf32>
    %26 = tpu.matmul %25, %0, %cst_16 {dimension_numbers = #tpu.dot_dimension_numbers<[1], [0], [0], [1], [0, 0, 1, 1], [], []>} : vector<512x10xbf16>, vector<10x128xbf16>, vector<512x128xf32> -> vector<512x128xf32>
    %27 = vector.shape_cast %26 : vector<512x128xf32> to vector<8x64x128xf32>
    %cst_17 = arith.constant dense<0xFF800000> : vector<8x128xf32>
    %28 = vector.multi_reduction <maximumf>, %27, %cst_17 [1] : vector<8x64x128xf32> to vector<8x128xf32>
    %29 = arith.maximumf %22, %28 : vector<8x128xf32>
    %c0_i32 = arith.constant 0 : i32
    %30 = arith.cmpi eq, %arg1, %c0_i32 : i32
    %31 = arith.extui %30 : i1 to i32
    %c0_i32_18 = arith.constant 0 : i32
    %32 = arith.cmpi ne, %31, %c0_i32_18 : i32
    scf.if %32 {
      %c0_23 = arith.constant 0 : index
      %c0_24 = arith.constant 0 : index
      %39 = vector.load %arg5[%c0_23, %c0_24] : memref<8x128xf32, #tpu.memory_space<vmem>>, vector<8x128xf32>
      tpu.vector_store %arg5[%c0_23, %c0_24], %29 {strides = array<i32>} : memref<8x128xf32, #tpu.memory_space<vmem>>, vector<8x128xf32>,
    } else {
    }
    %c0_i32_19 = arith.constant 0 : i32
    %33 = arith.cmpi sgt, %arg1, %c0_i32_19 : i32
    %34 = arith.extui %33 : i1 to i32
    %c0_i32_20 = arith.constant 0 : i32
    %35 = arith.cmpi ne, %34, %c0_i32_20 : i32
    scf.if %35 {
      %c0_23 = arith.constant 0 : index
      %c0_24 = arith.constant 0 : index
      %39 = vector.load %arg5[%c0_23, %c0_24] : memref<8x128xf32, #tpu.memory_space<vmem>>, vector<8x128xf32>
      %40 = arith.maximumf %39, %29 : vector<8x128xf32>
      %c0_25 = arith.constant 0 : index
      %c0_26 = arith.constant 0 : index
      %41 = vector.load %arg5[%c0_25, %c0_26] : memref<8x128xf32, #tpu.memory_space<vmem>>, vector<8x128xf32>
      tpu.vector_store %arg5[%c0_25, %c0_26], %40 {strides = array<i32>} : memref<8x128xf32, #tpu.memory_space<vmem>>, vector<8x128xf32>,
    } else {
    }
    %c0_i32_21 = arith.constant 0 : i32
    %36 = arith.cmpi eq, %arg1, %c0_i32_21 : i32
    %37 = arith.extui %36 : i1 to i32
    %c0_i32_22 = arith.constant 0 : i32
    %38 = arith.cmpi ne, %37, %c0_i32_22 : i32
    scf.if %38 {
      %c0_23 = arith.constant 0 : index
      %c0_24 = arith.constant 0 : index
      %39 = vector.load %arg5[%c0_23, %c0_24] : memref<8x128xf32, #tpu.memory_space<vmem>>, vector<8x128xf32>
      %c0_25 = arith.constant 0 : index
      %c0_26 = arith.constant 0 : index
      %40 = vector.load %arg4[%c0_25, %c0_26] : memref<1x128xf32, #tpu.memory_space<vmem>>, vector<1x128xf32>
      %41 = vector.broadcast %40 : vector<1x128xf32> to vector<8x128xf32>
      %42 = arith.addf %39, %41 : vector<8x128xf32>
      %cst_27 = arith.constant 0.000000e+00 : f32
      %43 = vector.broadcast %cst_27 : f32 to vector<8x128xf32>
      %44 = arith.maximumf %42, %43 : vector<8x128xf32>
      %c0_28 = arith.constant 0 : index
      %c0_29 = arith.constant 0 : index
      %45 = vector.load %arg5[%c0_28, %c0_29] : memref<8x128xf32, #tpu.memory_space<vmem>>, vector<8x128xf32>
      tpu.vector_store %arg5[%c0_28, %c0_29], %44 {strides = array<i32>} : memref<8x128xf32, #tpu.memory_space<vmem>>, vector<8x128xf32>,
    } else {
    }
    return
  }
  func.func @transform_0(%arg0: i32, %arg1: i32) -> (i32, i32, i32) {
    %c0_i32 = arith.constant 0 : i32
    %c0_i32_0 = arith.constant 0 : i32
    return %arg0, %arg1, %c0_i32 : i32, i32, i32
  }
  func.func @transform_1(%arg0: i32, %arg1: i32) -> (i32, i32) {
    %c0_i32 = arith.constant 0 : i32
    %c0_i32_0 = arith.constant 0 : i32
    %c0_i32_1 = arith.constant 0 : i32
    return %c0_i32, %c0_i32_0 : i32, i32
  }
  func.func @transform_2(%arg0: i32, %arg1: i32) -> (i32, i32) {
    %c0_i32 = arith.constant 0 : i32
    %c0_i32_0 = arith.constant 0 : i32
    %c0_i32_1 = arith.constant 0 : i32
    return %c0_i32, %c0_i32_0 : i32, i32
  }
  func.func @transform_3(%arg0: i32, %arg1: i32) -> (i32, i32) {
    %c0_i32 = arith.constant 0 : i32
    %c0_i32_0 = arith.constant 0 : i32
    return %arg0, %c0_i32 : i32, i32
  }
}

</mosaic_0001>

<bundles_post_ra>
// kernel: cnn_block_forward.1
= control target key start
LH: loop header
LB: loop body
LE: loop exit
PB: predicated region body
PF: predicated region fallthrough
CT: control target
= control target key end

     0   :  { %8 = vsyncpa [#allocation3], 0  ;;  %s4014_s0 = inlined_call_operand.vmem [shape: f32[16,256,10], index: 0, kind: input, shape index: {}]   ;;  %s4015_s1 = inlined_call_operand.vmem [shape: bf16[10,128], index: 1, kind: input, shape index: {}]   ;;  %s4016_s2 = inlined_call_operand.vmem [shape: f32[1,128], index: 2, kind: input, shape index: {}]   ;;  %s4017_s3 = inlined_call_operand.hbm [shape: f32[16,128], index: 3, kind: output, shape index: {}]  }
   0x1   :  { %10 = vsyncpa [#allocation3 + $0x1], 0  ;;  %s3439_s12 = smov 0   ;;  %s3441_s13 = smov 0  }
   0x2   :  { %s3443_s14 = smov 0   ;;  %s3445_s15 = smov 0  }
   0x3   :  { %s3447_s16 = smov 0   ;;  %s3449_s17 = smov 0  }
   0x4 LB: > { %s2738_s18 = sadd.s32 4294967295, %s3416_s17   ;;  %s2739_s19 = sadd.s32 4294967294, %s3416_s17   ;;  %s3416_s17 = sphi %s3449_s17, %s16_s17   ;;  %s3412_s16 = sphi %s3447_s16, %s4024_s16   ;;  %s3408_s15 = sphi %s3445_s15, %s4023_s15   ;;  %s3404_s14 = sphi %s3443_s14, %s4022_s14   ;;  %s3400_s13 = sphi %s3441_s13, %s4021_s13   ;;  %s3396_s12 = sphi %s3439_s12, %s4020_s12  }
   0x5   : > { %s28_s20 = sadd.s32 1, %s3412_s16  ;;  %s105_s21 = sadd.s32 1, %s3404_s14 }
   0x6   : > { %p30_p0 = scmp.ge.s32.totalorder %s28_s20, 2  ;;  %p115_p1 = scmp.ne.s32.totalorder %s3404_s14, %s3400_s13 }
   0x7   : > { %p116_p2 = scmp.eq.s32.totalorder %s2738_s18, 1  ;;  %p121_p3 = scmp.ne.s32.totalorder %s3400_s13, %s3396_s12 }
   0x8   : > { %s4026_s20 = smov (%p30_p0, %s28_s20), 0  ;;  %p122_p5 = scmp.eq.s32.totalorder %s2739_s19, 1 }
   0x9   : > { %p3479_p4 = por %p116_p2, %p115_p1  ;;  %s102_s23 = ssub.s32 %s3412_s16, %s4026_s20 }
   0xa   : > { %p2742_p6 = scmp.ge.s32.totalorder %s3416_s17, 1  ;;  %p103_p7 = scmp.eq.s32.totalorder %s102_s23, 0 }
   0xb   : > { %p3486_p8 = por %p122_p5, %p121_p3  ;;  %p161_p9 = scmp.lt.s32.totalorder %s3416_s17, 3 }
   0xc   : > { %s3492_s25 = scalar_select %p103_p7, %s3404_s14, %s105_s21  }
   0xd   : > { %p162_p10 = pnand %p2742_p6, %p161_p9 }
   0xe   : > { %v3337_v0 = vld [vmem:[%s4015_s1] sm:$0x1f] (!%p162_p10)   ;;  %vm403_vm0 = vcmask (!%p162_p10), 1044480   ;;  %s2744_s28 = sshll.u32 (!%p162_p10), %s3408_s15, 3  ;;  %vm306_vm1 = vcmask (!%p162_p10), 80896   ;;  %vm2591_vm2 = vcmask (!%p162_p10), 1041409  }
   0xf   : > { %165 = sbr.rel (%p162_p10) target bundleno = 533 (0x215), region = 32  ;;  %3278 = vmatprep.subr.msk.bf16.mxu0 (!%p162_p10), %vm403_vm0, %v3337_v0  ;;  %v405_v1 = vsel (!%p162_p10), %vm403_vm0, %v3337_v0, 0  ;;  %3279 = vmatprep.subr.msk.bf16.mxu1 (!%p162_p10), %vm403_vm0, %v3337_v0  ;;  %p192_p11 = scmp.lt.s32.totalorder (!%p162_p10), %s2744_s28, 15  ;;  %vm2593_vm3 = vcmask (!%p162_p10), 1042434   ;;  %vm2595_vm4 = vcmask (!%p162_p10), 1043459   ;;  %vm2597_vm5 = vcmask (!%p162_p10), 1044484  }
  0x10   : > { %3015 = vmatpush3.bf16.msra.mxu0 (!%p162_p10), %v405_v1  ;;  %3081 = vmatpush3.bf16.msra.mxu1 (!%p162_p10), %v405_v1  ;;  %vm2599_vm6 = vcmask (!%p162_p10), 1045509   ;;  %vm2601_vm7 = vcmask (!%p162_p10), 1046534   ;;  %s187_s6 = sand.u32 (!%p162_p10), 1, %s3400_s13   ;;  %vm2603_vm8 = vcmask (!%p162_p10), 1047559   ;;  %s2878_s10 = sshll.u32 (!%p162_p10), %s3408_s15, 7 }
  0x11   : > { %3280 = vmatprep.subr.msk.bf16.mxu0 (!%p162_p10), %vm403_vm0, %v3337_v0  ;;  %3281 = vmatprep.subr.msk.bf16.mxu1 (!%p162_p10), %vm403_vm0, %v3337_v0  ;;  %s2743_s7 = sshll.u32 (!%p162_p10), %s187_s6, 3  ;;  %s3967_s23 = scalar_lea.hbm (!%p162_p10), %s4017_s3, %s2878_s10 }
  0x12   : > { %s189_s11 = scalar_lea.vmem (!%p162_p10), [#allocation2], %s2743_s7  ;;  %s2652_s26 = scalar_lea.sflag (!%p162_p10), [#allocation3], %s187_s6 }
  0x13   : > { %s2665_s18 = sshll.u32 (!%p162_p10), %s189_s11, 4  ;;  %s3418_s15 = smov (!%p162_p10), [#allocation2]   ;;  %s3969_s18 = int_to_ptr.vmem [resolvable:$true] %s2665_s18 }
  0x14   : > { %s3338_s27 = scalar_lea.vmem (!%p162_p10), %s3969_s18, 128 }
  0x15   : > { %p3339_p12 = scmp.ne.s32.totalorder (!%p162_p10), %s3969_s18, %s3338_s27 }
  0x16   : > { %s4028_s28 = smov (!%p192_p11, %s2744_s28), 15 }
  0x17   : > { %s2881_s29 = sshll.u32 %s4028_s28, 8  ;;  %p3340_p13 = pnand %p3339_p12, %p3479_p4 }
  0x18   : > { %s3501_s5 = scalar_lea.vmem %s4014_s0, %s2881_s29  ;;  %s3342_s28 = sshll.u32 %s3418_s15, 4  ;;  %s3343_s28 = int_to_ptr.vmem [resolvable:$false] %s3342_s28 }
  0x19   : > { %v205_v2 = vld [vmem:[%s3501_s5] sm:$0xff]  ;;  %v206_v3 = vld [vmem:[%s3501_s5 + $0x8] sm:$0xff]  ;;  %v207_v7 = vld [vmem:[%s3501_s5 + $0x10] sm:$0xff]  ;;  %p3341_p0 = pneg %p3340_p13  ;;  %s3344_s29 = scalar_lea.vmem %s3343_s28, 256 }
  0x1a   : > { %v800_v4 = vld [vmem:[%s3501_s5 + $0x40] sm:$0xff]  ;;  %v269_v5 = vpack.c.bf16 %v206_v3, %v205_v2  ;;  %v801_v6 = vld [vmem:[%s3501_s5 + $0x48] sm:$0xff]  ;;  %v208_v8 = vld [vmem:[%s3501_s5 + $0x18] sm:$0xff]  ;;  %p3345_p1 = scmp.lt.s32.totalorder %s3969_s18, %s3343_s28  ;;  %p3346_p2 = scmp.lt.s32.totalorder %s3344_s29, %s3338_s27 }
  0x1b   : > { %v864_v9 = vpack.c.bf16 %v801_v6, %v800_v4  ;;  %v270_v10 = vpack.c.bf16 %v208_v8, %v207_v7  ;;  %v802_v11 = vld [vmem:[%s3501_s5 + $0x50] sm:$0xff]  ;;  %v803_v12 = vld [vmem:[%s3501_s5 + $0x58] sm:$0xff]  ;;  %v209_v13 = vld [vmem:[%s3501_s5 + $0x20] sm:$0xff] }
  0x1c   : > { %3016 = vmatprep.mubr.msk.bf16.mxu0 %vm306_vm1, %v269_v5  ;;  %v865_v14 = vpack.c.bf16 %v803_v12, %v802_v11  ;;  %v210_v15 = vld [vmem:[%s3501_s5 + $0x28] sm:$0xff]  ;;  %v804_v16 = vld [vmem:[%s3501_s5 + $0x60] sm:$0xff]  ;;  %v211_v20 = vld [vmem:[%s3501_s5 + $0x30] sm:$0xff]  ;;  %p3347_p3 = por %p3346_p2, %p3345_p1 }
  0x1d   : > { %v805_v17 = vld [vmem:[%s3501_s5 + $0x68] sm:$0xff]  ;;  %3082 = vmatprep.mubr.msk.bf16.mxu1 %vm306_vm1, %v864_v9  ;;  %3017 = vmatmul.mubr.msk.bf16.vlgmr.msra.gmra.mrb[0].mxu0 %vm306_vm1, %v270_v10  ;;  %v271_v18 = vpack.c.bf16 %v210_v15, %v209_v13  ;;  %v212_v21 = vld [vmem:[%s3501_s5 + $0x38] sm:$0xff]  ;;  %v806_v22 = vld [vmem:[%s3501_s5 + $0x70] sm:$0xff] }
  0x1e   : > { %v866_v19 = vpack.c.bf16 %v805_v17, %v804_v16  ;;  %3083 = vmatmul.mubr.msk.bf16.vlgmr.msra.gmra.mrb[0].mxu1 %vm306_vm1, %v865_v14  ;;  %3147 = vmatpush3.bf16.msra.mxu0 %v405_v1  ;;  %v807_v23 = vld [vmem:[%s3501_s5 + $0x78] sm:$0xff]  ;;  %v213_v24 = vld [vmem:[%s3501_s5 + $0x100] sm:$0xff]  ;;  %v214_v25 = vld [vmem:[%s3501_s5 + $0x108] sm:$0xff]  ;;  %v272_v28 = vpack.c.bf16 %v212_v21, %v211_v20  ;;  %p3348_p5 = pnand %p3347_p3, %p3341_p0 }
  0x1f   : > { %3213 = vmatpush3.bf16.msra.mxu1 %v405_v1  ;;  %3020 = vmatprep.mubr.msk.bf16.mxu0 %vm306_vm1, %v271_v18  ;;  %v808_v26 = vld [vmem:[%s3501_s5 + $0x140] sm:$0xff]  ;;  %v809_v27 = vld [vmem:[%s3501_s5 + $0x148] sm:$0xff]  ;;  %v867_v29 = vpack.c.bf16 %v807_v23, %v806_v22  ;;  %v273_v30 = vpack.c.bf16 %v214_v25, %v213_v24  ;;  %v215_v32 = vld [vmem:[%s3501_s5 + $0x110] sm:$0xff] }
  0x20   : > { %3086 = vmatprep.mubr.msk.bf16.mxu1 %vm306_vm1, %v866_v19  ;;  %v868_v31 = vpack.c.bf16 %v809_v27, %v808_v26  ;;  %v216_v33 = vld [vmem:[%s3501_s5 + $0x118] sm:$0xff]  ;;  %v810_v34 = vld [vmem:[%s3501_s5 + $0x150] sm:$0xff]  ;;  %v217_v36 = vld [vmem:[%s3501_s5 + $0x120] sm:$0xff] }
  0x21   : > { %v811_v35 = vld [vmem:[%s3501_s5 + $0x158] sm:$0xff]  ;;  %v218_v37 = vld [vmem:[%s3501_s5 + $0x128] sm:$0xff]  ;;  %v812_v38 = vld [vmem:[%s3501_s5 + $0x160] sm:$0xff]  ;;  %v274_v40 = vpack.c.bf16 %v216_v33, %v215_v32 }
  0x22   : > { %v813_v39 = vld [vmem:[%s3501_s5 + $0x168] sm:$0xff]  ;;  %v869_v41 = vpack.c.bf16 %v811_v35, %v810_v34  ;;  %v275_v42 = vpack.c.bf16 %v218_v37, %v217_v36  ;;  %v219_v44 = vld [vmem:[%s3501_s5 + $0x130] sm:$0xff]  ;;  %v220_v45 = vld [vmem:[%s3501_s5 + $0x138] sm:$0xff] }
  0x23   : > { %v870_v43 = vpack.c.bf16 %v813_v39, %v812_v38  ;;  %v814_v46 = vld [vmem:[%s3501_s5 + $0x170] sm:$0xff]  ;;  %v815_v47 = vld [vmem:[%s3501_s5 + $0x178] sm:$0xff]  ;;  %v221_v48 = vld [vmem:[%s3501_s5 + $0x200] sm:$0xff]  ;;  %v276_v52 = vpack.c.bf16 %v220_v45, %v219_v44 }
  0x24   : > { %v222_v49 = vld [vmem:[%s3501_s5 + $0x208] sm:$0xff]  ;;  %v816_v50 = vld [vmem:[%s3501_s5 + $0x240] sm:$0xff]  ;;  %v871_v53 = vpack.c.bf16 %v815_v47, %v814_v46  ;;  %v223_v56 = vld [vmem:[%s3501_s5 + $0x210] sm:$0xff] }
  0x25   : > { %3021 = vmatmul.mubr.msk.bf16.gmra.mrb[4].mxu0 %vm306_vm1, %v272_v28  ;;  %v817_v51 = vld [vmem:[%s3501_s5 + $0x248] sm:$0xff]  ;;  %v277_v54 = vpack.c.bf16 %v222_v49, %v221_v48  ;;  %v224_v57 = vld [vmem:[%s3501_s5 + $0x218] sm:$0xff]  ;;  %v818_v58 = vld [vmem:[%s3501_s5 + $0x250] sm:$0xff] }
  0x26   : > { %3087 = vmatmul.mubr.msk.bf16.gmra.mrb[4].mxu1 %vm306_vm1, %v867_v29  ;;  %3024 = vmatprep.mubr.msk.bf16.mxu0 %vm306_vm1, %v273_v30  ;;  %v872_v55 = vpack.c.bf16 %v817_v51, %v816_v50  ;;  %v819_v59 = vld [vmem:[%s3501_s5 + $0x258] sm:$0xff]  ;;  %v225_v60 = vld [vmem:[%s3501_s5 + $0x220] sm:$0xff]  ;;  %v226_v61 = vld [vmem:[%s3501_s5 + $0x228] sm:$0xff]  ;;  %v278_v0 = vpack.c.bf16 %v224_v57, %v223_v56 }
  0x27   : > { %3090 = vmatprep.mubr.msk.bf16.mxu1 %vm306_vm1, %v868_v31  ;;  %v820_v62 = vld [vmem:[%s3501_s5 + $0x260] sm:$0xff]  ;;  %v821_v63 = vld [vmem:[%s3501_s5 + $0x268] sm:$0xff]  ;;  %v873_v1 = vpack.c.bf16 %v819_v59, %v818_v58  ;;  %v279_v2 = vpack.c.bf16 %v226_v61, %v225_v60  ;;  %v227_v4 = vld [vmem:[%s3501_s5 + $0x230] sm:$0xff] }
  0x28   : > { %v874_v3 = vpack.c.bf16 %v821_v63, %v820_v62  ;;  %v228_v5 = vld [vmem:[%s3501_s5 + $0x238] sm:$0xff]  ;;  %v822_v6 = vld [vmem:[%s3501_s5 + $0x270] sm:$0xff]  ;;  %v229_v8 = vld [vmem:[%s3501_s5 + $0x300] sm:$0xff] }
  0x29   : > { %v823_v7 = vld [vmem:[%s3501_s5 + $0x278] sm:$0xff]  ;;  %v230_v9 = vld [vmem:[%s3501_s5 + $0x308] sm:$0xff]  ;;  %v824_v10 = vld [vmem:[%s3501_s5 + $0x340] sm:$0xff]  ;;  %v280_v12 = vpack.c.bf16 %v228_v5, %v227_v4 }
  0x2a   : > { %v825_v11 = vld [vmem:[%s3501_s5 + $0x348] sm:$0xff]  ;;  %v875_v13 = vpack.c.bf16 %v823_v7, %v822_v6  ;;  %v281_v14 = vpack.c.bf16 %v230_v9, %v229_v8  ;;  %v231_v16 = vld [vmem:[%s3501_s5 + $0x310] sm:$0xff]  ;;  %v232_v17 = vld [vmem:[%s3501_s5 + $0x318] sm:$0xff] }
  0x2b   : > { %v876_v15 = vpack.c.bf16 %v825_v11, %v824_v10  ;;  %v826_v18 = vld [vmem:[%s3501_s5 + $0x350] sm:$0xff]  ;;  %v827_v19 = vld [vmem:[%s3501_s5 + $0x358] sm:$0xff]  ;;  %v233_v20 = vld [vmem:[%s3501_s5 + $0x320] sm:$0xff]  ;;  %v282_v24 = vpack.c.bf16 %v232_v17, %v231_v16 }
  0x2c   : > { %v234_v21 = vld [vmem:[%s3501_s5 + $0x328] sm:$0xff]  ;;  %v828_v22 = vld [vmem:[%s3501_s5 + $0x360] sm:$0xff]  ;;  %v877_v25 = vpack.c.bf16 %v827_v19, %v826_v18  ;;  %v235_v28 = vld [vmem:[%s3501_s5 + $0x330] sm:$0xff] }
  0x2d   : > { %3025 = vmatmul.mubr.msk.bf16.gmra.mrb[8].mxu0 %vm306_vm1, %v274_v40  ;;  %v829_v23 = vld [vmem:[%s3501_s5 + $0x368] sm:$0xff]  ;;  %v283_v26 = vpack.c.bf16 %v234_v21, %v233_v20  ;;  %v236_v29 = vld [vmem:[%s3501_s5 + $0x338] sm:$0xff]  ;;  %v830_v30 = vld [vmem:[%s3501_s5 + $0x370] sm:$0xff] }
  0x2e   : > { %3091 = vmatmul.mubr.msk.bf16.gmra.mrb[8].mxu1 %vm306_vm1, %v869_v41  ;;  %3028 = vmatprep.mubr.msk.bf16.mxu0 %vm306_vm1, %v275_v42  ;;  %v878_v27 = vpack.c.bf16 %v829_v23, %v828_v22  ;;  %v831_v31 = vld [vmem:[%s3501_s5 + $0x378] sm:$0xff]  ;;  %v237_v32 = vld [vmem:[%s3501_s5 + $0x400] sm:$0xff]  ;;  %v238_v33 = vld [vmem:[%s3501_s5 + $0x408] sm:$0xff]  ;;  %v284_v36 = vpack.c.bf16 %v236_v29, %v235_v28 }
  0x2f   : > { %3094 = vmatprep.mubr.msk.bf16.mxu1 %vm306_vm1, %v870_v43  ;;  %v832_v34 = vld [vmem:[%s3501_s5 + $0x440] sm:$0xff]  ;;  %v833_v35 = vld [vmem:[%s3501_s5 + $0x448] sm:$0xff]  ;;  %v879_v37 = vpack.c.bf16 %v831_v31, %v830_v30  ;;  %v285_v38 = vpack.c.bf16 %v238_v33, %v237_v32  ;;  %v239_v40 = vld [vmem:[%s3501_s5 + $0x410] sm:$0xff] }
  0x30   : > { %v880_v39 = vpack.c.bf16 %v833_v35, %v832_v34  ;;  %v240_v41 = vld [vmem:[%s3501_s5 + $0x418] sm:$0xff]  ;;  %v834_v42 = vld [vmem:[%s3501_s5 + $0x450] sm:$0xff]  ;;  %v241_v44 = vld [vmem:[%s3501_s5 + $0x420] sm:$0xff] }
  0x31   : > { %v835_v43 = vld [vmem:[%s3501_s5 + $0x458] sm:$0xff]  ;;  %v242_v45 = vld [vmem:[%s3501_s5 + $0x428] sm:$0xff]  ;;  %v836_v46 = vld [vmem:[%s3501_s5 + $0x460] sm:$0xff]  ;;  %v286_v48 = vpack.c.bf16 %v240_v41, %v239_v40 }
  0x32   : > { %v837_v47 = vld [vmem:[%s3501_s5 + $0x468] sm:$0xff]  ;;  %v881_v49 = vpack.c.bf16 %v835_v43, %v834_v42  ;;  %v287_v50 = vpack.c.bf16 %v242_v45, %v241_v44  ;;  %v245_v56 = vld [vmem:[%s3501_s5 + $0x500] sm:$0xff] }
  0x33   : > { %v882_v51 = vpack.c.bf16 %v837_v47, %v836_v46  ;;  %v246_v57 = vld [vmem:[%s3501_s5 + $0x508] sm:$0xff]  ;;  %v840_v58 = vld [vmem:[%s3501_s5 + $0x540] sm:$0xff] }
  0x34   : > { %v841_v59 = vld [vmem:[%s3501_s5 + $0x548] sm:$0xff]  ;;  %v289_v62 = vpack.c.bf16 %v246_v57, %v245_v56  ;;  %v249_v4 = vld [vmem:[%s3501_s5 + $0x520] sm:$0xff] }
  0x35   : > { %3029 = vmatmul.mubr.msk.bf16.gmra.mrb[12].mxu0 %vm306_vm1, %v276_v52  ;;  %v243_v52 = vld [vmem:[%s3501_s5 + $0x430] sm:$0xff]  ;;  %v884_v63 = vpack.c.bf16 %v841_v59, %v840_v58  ;;  %v250_v5 = vld [vmem:[%s3501_s5 + $0x528] sm:$0xff]  ;;  %v844_v6 = vld [vmem:[%s3501_s5 + $0x560] sm:$0xff] }
  0x36   : > { %3095 = vmatmul.mubr.msk.bf16.gmra.mrb[12].mxu1 %vm306_vm1, %v871_v53  ;;  %3032 = vmatprep.mubr.msk.bf16.mxu0 %vm306_vm1, %v277_v54  ;;  %v244_v53 = vld [vmem:[%s3501_s5 + $0x438] sm:$0xff]  ;;  %v838_v54 = vld [vmem:[%s3501_s5 + $0x470] sm:$0xff]  ;;  %v845_v7 = vld [vmem:[%s3501_s5 + $0x568] sm:$0xff]  ;;  %v291_v10 = vpack.c.bf16 %v250_v5, %v249_v4 }
  0x37   : > { %3098 = vmatprep.mubr.msk.bf16.mxu1 %vm306_vm1, %v872_v55  ;;  %v839_v55 = vld [vmem:[%s3501_s5 + $0x478] sm:$0xff]  ;;  %v288_v60 = vpack.c.bf16 %v244_v53, %v243_v52  ;;  %v886_v11 = vpack.c.bf16 %v845_v7, %v844_v6  ;;  %v253_v16 = vld [vmem:[%s3501_s5 + $0x600] sm:$0xff]  ;;  %v254_v17 = vld [vmem:[%s3501_s5 + $0x608] sm:$0xff] }
  0x38   : > { %v883_v61 = vpack.c.bf16 %v839_v55, %v838_v54  ;;  %v848_v18 = vld [vmem:[%s3501_s5 + $0x640] sm:$0xff]  ;;  %v849_v19 = vld [vmem:[%s3501_s5 + $0x648] sm:$0xff]  ;;  %v293_v22 = vpack.c.bf16 %v254_v17, %v253_v16 }
  0x39   : > { %v888_v23 = vpack.c.bf16 %v849_v19, %v848_v18  ;;  %v257_v28 = vld [vmem:[%s3501_s5 + $0x620] sm:$0xff]  ;;  %v258_v29 = vld [vmem:[%s3501_s5 + $0x628] sm:$0xff] }
  0x3a   : > { %v852_v30 = vld [vmem:[%s3501_s5 + $0x660] sm:$0xff]  ;;  %v853_v31 = vld [vmem:[%s3501_s5 + $0x668] sm:$0xff]  ;;  %v295_v34 = vpack.c.bf16 %v258_v29, %v257_v28 }
  0x3b   : > { %v890_v35 = vpack.c.bf16 %v853_v31, %v852_v30  ;;  %v261_v40 = vld [vmem:[%s3501_s5 + $0x700] sm:$0xff]  ;;  %v262_v41 = vld [vmem:[%s3501_s5 + $0x708] sm:$0xff] }
  0x3c   : > { %v856_v42 = vld [vmem:[%s3501_s5 + $0x740] sm:$0xff]  ;;  %v857_v43 = vld [vmem:[%s3501_s5 + $0x748] sm:$0xff]  ;;  %v297_v46 = vpack.c.bf16 %v262_v41, %v261_v40 }
  0x3d   : > { %3033 = vmatmul.mubr.msk.bf16.gmra.mrb[16].mxu0 %vm306_vm1, %v278_v0  ;;  %v247_v0 = vld [vmem:[%s3501_s5 + $0x510] sm:$0xff]  ;;  %v892_v47 = vpack.c.bf16 %v857_v43, %v856_v42  ;;  %v265_v52 = vld [vmem:[%s3501_s5 + $0x720] sm:$0xff]  ;;  %v266_v53 = vld [vmem:[%s3501_s5 + $0x728] sm:$0xff] }
  0x3e   : > { %3099 = vmatmul.mubr.msk.bf16.gmra.mrb[16].mxu1 %vm306_vm1, %v873_v1  ;;  %3036 = vmatprep.mubr.msk.bf16.mxu0 %vm306_vm1, %v279_v2  ;;  %v248_v1 = vld [vmem:[%s3501_s5 + $0x518] sm:$0xff]  ;;  %v842_v2 = vld [vmem:[%s3501_s5 + $0x550] sm:$0xff]  ;;  %v860_v54 = vld [vmem:[%s3501_s5 + $0x760] sm:$0xff]  ;;  %v299_v58 = vpack.c.bf16 %v266_v53, %v265_v52 }
  0x3f   : > { %3102 = vmatprep.mubr.msk.bf16.mxu1 %vm306_vm1, %v874_v3  ;;  %v843_v3 = vld [vmem:[%s3501_s5 + $0x558] sm:$0xff]  ;;  %v290_v8 = vpack.c.bf16 %v248_v1, %v247_v0  ;;  %v861_v55 = vld [vmem:[%s3501_s5 + $0x768] sm:$0xff]  ;;  %v1393_v0 = vld [vmem:[%s3501_s5 + $0x80] sm:$0xff] }
  0x40   : > { %v885_v9 = vpack.c.bf16 %v843_v3, %v842_v2  ;;  %v894_v59 = vpack.c.bf16 %v861_v55, %v860_v54  ;;  %v1394_v1 = vld [vmem:[%s3501_s5 + $0x88] sm:$0xff]  ;;  %v1986_v2 = vld [vmem:[%s3501_s5 + $0xc0] sm:$0xff] }
  0x41   : > { %v1987_v3 = vld [vmem:[%s3501_s5 + $0xc8] sm:$0xff]  ;;  %v1457_v6 = vpack.c.bf16 %v1394_v1, %v1393_v0 }
  0x42   : > { %v2050_v7 = vpack.c.bf16 %v1987_v3, %v1986_v2 }
  0x45   : > { %3037 = vmatmul.mubr.msk.bf16.gmra.mrb[20].mxu0 %vm306_vm1, %v280_v12  ;;  %v251_v12 = vld [vmem:[%s3501_s5 + $0x530] sm:$0xff] }
  0x46   : > { %3103 = vmatmul.mubr.msk.bf16.gmra.mrb[20].mxu1 %vm306_vm1, %v875_v13  ;;  %3040 = vmatprep.mubr.msk.bf16.mxu0 %vm306_vm1, %v281_v14  ;;  %v252_v13 = vld [vmem:[%s3501_s5 + $0x538] sm:$0xff]  ;;  %v846_v14 = vld [vmem:[%s3501_s5 + $0x570] sm:$0xff] }
  0x47   : > { %3106 = vmatprep.mubr.msk.bf16.mxu1 %vm306_vm1, %v876_v15  ;;  %v847_v15 = vld [vmem:[%s3501_s5 + $0x578] sm:$0xff]  ;;  %v292_v20 = vpack.c.bf16 %v252_v13, %v251_v12  ;;  %v1397_v12 = vld [vmem:[%s3501_s5 + $0xa0] sm:$0xff]  ;;  %v1398_v13 = vld [vmem:[%s3501_s5 + $0xa8] sm:$0xff] }
  0x48   : > { %v887_v21 = vpack.c.bf16 %v847_v15, %v846_v14  ;;  %v1990_v14 = vld [vmem:[%s3501_s5 + $0xe0] sm:$0xff]  ;;  %v1991_v15 = vld [vmem:[%s3501_s5 + $0xe8] sm:$0xff]  ;;  %v1459_v18 = vpack.c.bf16 %v1398_v13, %v1397_v12 }
  0x49   : > { %v2052_v19 = vpack.c.bf16 %v1991_v15, %v1990_v14 }
  0x4d   : > { %3041 = vmatmul.mubr.msk.bf16.gmra.mrb[24].mxu0 %vm306_vm1, %v282_v24  ;;  %v255_v24 = vld [vmem:[%s3501_s5 + $0x610] sm:$0xff] }
  0x4e   : > { %3107 = vmatmul.mubr.msk.bf16.gmra.mrb[24].mxu1 %vm306_vm1, %v877_v25  ;;  %3044 = vmatprep.mubr.msk.bf16.mxu0 %vm306_vm1, %v283_v26  ;;  %v256_v25 = vld [vmem:[%s3501_s5 + $0x618] sm:$0xff]  ;;  %v850_v26 = vld [vmem:[%s3501_s5 + $0x650] sm:$0xff] }
  0x4f   : > { %3110 = vmatprep.mubr.msk.bf16.mxu1 %vm306_vm1, %v878_v27  ;;  %v851_v27 = vld [vmem:[%s3501_s5 + $0x658] sm:$0xff]  ;;  %v294_v32 = vpack.c.bf16 %v256_v25, %v255_v24  ;;  %v1401_v24 = vld [vmem:[%s3501_s5 + $0x180] sm:$0xff]  ;;  %v1402_v25 = vld [vmem:[%s3501_s5 + $0x188] sm:$0xff] }
  0x50   : > { %v889_v33 = vpack.c.bf16 %v851_v27, %v850_v26  ;;  %v1994_v26 = vld [vmem:[%s3501_s5 + $0x1c0] sm:$0xff]  ;;  %v1995_v27 = vld [vmem:[%s3501_s5 + $0x1c8] sm:$0xff]  ;;  %v1461_v30 = vpack.c.bf16 %v1402_v25, %v1401_v24 }
  0x51   : > { %v2054_v31 = vpack.c.bf16 %v1995_v27, %v1994_v26 }
  0x55   : > { %3045 = vmatmul.mubr.msk.bf16.gmra.mrb[28].mxu0 %vm306_vm1, %v284_v36  ;;  %v259_v36 = vld [vmem:[%s3501_s5 + $0x630] sm:$0xff] }
  0x56   : > { %3111 = vmatmul.mubr.msk.bf16.gmra.mrb[28].mxu1 %vm306_vm1, %v879_v37  ;;  %3048 = vmatprep.mubr.msk.bf16.mxu0 %vm306_vm1, %v285_v38  ;;  %v260_v37 = vld [vmem:[%s3501_s5 + $0x638] sm:$0xff]  ;;  %v854_v38 = vld [vmem:[%s3501_s5 + $0x670] sm:$0xff] }
  0x57   : > { %3114 = vmatprep.mubr.msk.bf16.mxu1 %vm306_vm1, %v880_v39  ;;  %v855_v39 = vld [vmem:[%s3501_s5 + $0x678] sm:$0xff]  ;;  %v296_v44 = vpack.c.bf16 %v260_v37, %v259_v36  ;;  %v1405_v36 = vld [vmem:[%s3501_s5 + $0x1a0] sm:$0xff]  ;;  %v1406_v37 = vld [vmem:[%s3501_s5 + $0x1a8] sm:$0xff] }
  0x58   : > { %v891_v45 = vpack.c.bf16 %v855_v39, %v854_v38  ;;  %v1998_v38 = vld [vmem:[%s3501_s5 + $0x1e0] sm:$0xff]  ;;  %v1999_v39 = vld [vmem:[%s3501_s5 + $0x1e8] sm:$0xff]  ;;  %v1463_v42 = vpack.c.bf16 %v1406_v37, %v1405_v36 }
  0x59   : > { %v2056_v43 = vpack.c.bf16 %v1999_v39, %v1998_v38 }
  0x5d   : > { %3049 = vmatmul.mubr.msk.bf16.gmra.mrb[32].mxu0 %vm306_vm1, %v286_v48  ;;  %v263_v48 = vld [vmem:[%s3501_s5 + $0x710] sm:$0xff] }
  0x5e   : > { %3115 = vmatmul.mubr.msk.bf16.gmra.mrb[32].mxu1 %vm306_vm1, %v881_v49  ;;  %3052 = vmatprep.mubr.msk.bf16.mxu0 %vm306_vm1, %v287_v50  ;;  %v264_v49 = vld [vmem:[%s3501_s5 + $0x718] sm:$0xff]  ;;  %v858_v50 = vld [vmem:[%s3501_s5 + $0x750] sm:$0xff] }
  0x5f   : > { %3118 = vmatprep.mubr.msk.bf16.mxu1 %vm306_vm1, %v882_v51  ;;  %v859_v51 = vld [vmem:[%s3501_s5 + $0x758] sm:$0xff]  ;;  %v298_v56 = vpack.c.bf16 %v264_v49, %v263_v48  ;;  %v1409_v48 = vld [vmem:[%s3501_s5 + $0x280] sm:$0xff]  ;;  %v1410_v49 = vld [vmem:[%s3501_s5 + $0x288] sm:$0xff] }
  0x60   : > { %v893_v57 = vpack.c.bf16 %v859_v51, %v858_v50  ;;  %v2002_v50 = vld [vmem:[%s3501_s5 + $0x2c0] sm:$0xff]  ;;  %v2003_v51 = vld [vmem:[%s3501_s5 + $0x2c8] sm:$0xff]  ;;  %v1465_v54 = vpack.c.bf16 %v1410_v49, %v1409_v48 }
  0x61   : > { %v2058_v55 = vpack.c.bf16 %v2003_v51, %v2002_v50 }
  0x65   : > { %3053 = vmatmul.mubr.msk.bf16.gmra.mrb[36].mxu0 %vm306_vm1, %v288_v60  ;;  %v267_v60 = vld [vmem:[%s3501_s5 + $0x730] sm:$0xff] }
  0x66   : > { %3119 = vmatmul.mubr.msk.bf16.gmra.mrb[36].mxu1 %vm306_vm1, %v883_v61  ;;  %3056 = vmatprep.mubr.msk.bf16.mxu0 %vm306_vm1, %v289_v62  ;;  %v268_v61 = vld [vmem:[%s3501_s5 + $0x738] sm:$0xff]  ;;  %v862_v62 = vld [vmem:[%s3501_s5 + $0x770] sm:$0xff] }
  0x67   : > { %3122 = vmatprep.mubr.msk.bf16.mxu1 %vm306_vm1, %v884_v63  ;;  %v863_v63 = vld [vmem:[%s3501_s5 + $0x778] sm:$0xff]  ;;  %v300_v4 = vpack.c.bf16 %v268_v61, %v267_v60  ;;  %v1413_v60 = vld [vmem:[%s3501_s5 + $0x2a0] sm:$0xff]  ;;  %v1414_v61 = vld [vmem:[%s3501_s5 + $0x2a8] sm:$0xff] }
  0x68   : > { %v895_v5 = vpack.c.bf16 %v863_v63, %v862_v62  ;;  %v2006_v62 = vld [vmem:[%s3501_s5 + $0x2e0] sm:$0xff]  ;;  %v2007_v63 = vld [vmem:[%s3501_s5 + $0x2e8] sm:$0xff]  ;;  %v1467_v2 = vpack.c.bf16 %v1414_v61, %v1413_v60 }
  0x69   : > { %v2060_v3 = vpack.c.bf16 %v2007_v63, %v2006_v62 }
  0x6d   : > { %3057 = vmatmul.mubr.msk.bf16.gmra.mrb[40].mxu0 %vm306_vm1, %v290_v8  ;;  %v1395_v8 = vld [vmem:[%s3501_s5 + $0x90] sm:$0xff] }
  0x6e   : > { %3123 = vmatmul.mubr.msk.bf16.gmra.mrb[40].mxu1 %vm306_vm1, %v885_v9  ;;  %3060 = vmatprep.mubr.msk.bf16.mxu0 %vm306_vm1, %v291_v10  ;;  %v1396_v9 = vld [vmem:[%s3501_s5 + $0x98] sm:$0xff]  ;;  %v1988_v10 = vld [vmem:[%s3501_s5 + $0xd0] sm:$0xff] }
  0x6f   : > { %3126 = vmatprep.mubr.msk.bf16.mxu1 %vm306_vm1, %v886_v11  ;;  %v1989_v11 = vld [vmem:[%s3501_s5 + $0xd8] sm:$0xff]  ;;  %v1458_v16 = vpack.c.bf16 %v1396_v9, %v1395_v8  ;;  %v1417_v8 = vld [vmem:[%s3501_s5 + $0x380] sm:$0xff]  ;;  %v1418_v9 = vld [vmem:[%s3501_s5 + $0x388] sm:$0xff] }
  0x70   : > { %v2051_v17 = vpack.c.bf16 %v1989_v11, %v1988_v10  ;;  %v2010_v10 = vld [vmem:[%s3501_s5 + $0x3c0] sm:$0xff]  ;;  %v2011_v11 = vld [vmem:[%s3501_s5 + $0x3c8] sm:$0xff]  ;;  %v1469_v14 = vpack.c.bf16 %v1418_v9, %v1417_v8 }
  0x71   : > { %v2062_v15 = vpack.c.bf16 %v2011_v11, %v2010_v10 }
  0x75   : > { %3061 = vmatmul.mubr.msk.bf16.gmra.mrb[44].mxu0 %vm306_vm1, %v292_v20  ;;  %v1399_v20 = vld [vmem:[%s3501_s5 + $0xb0] sm:$0xff] }
  0x76   : > { %3127 = vmatmul.mubr.msk.bf16.gmra.mrb[44].mxu1 %vm306_vm1, %v887_v21  ;;  %3064 = vmatprep.mubr.msk.bf16.mxu0 %vm306_vm1, %v293_v22  ;;  %v1400_v21 = vld [vmem:[%s3501_s5 + $0xb8] sm:$0xff]  ;;  %v1992_v22 = vld [vmem:[%s3501_s5 + $0xf0] sm:$0xff] }
  0x77   : > { %3130 = vmatprep.mubr.msk.bf16.mxu1 %vm306_vm1, %v888_v23  ;;  %v1993_v23 = vld [vmem:[%s3501_s5 + $0xf8] sm:$0xff]  ;;  %v1460_v28 = vpack.c.bf16 %v1400_v21, %v1399_v20  ;;  %v1421_v20 = vld [vmem:[%s3501_s5 + $0x3a0] sm:$0xff]  ;;  %v1422_v21 = vld [vmem:[%s3501_s5 + $0x3a8] sm:$0xff] }
  0x78   : > { %v2053_v29 = vpack.c.bf16 %v1993_v23, %v1992_v22  ;;  %v2014_v22 = vld [vmem:[%s3501_s5 + $0x3e0] sm:$0xff]  ;;  %v2015_v23 = vld [vmem:[%s3501_s5 + $0x3e8] sm:$0xff]  ;;  %v1471_v26 = vpack.c.bf16 %v1422_v21, %v1421_v20 }
  0x79   : > { %v2064_v27 = vpack.c.bf16 %v2015_v23, %v2014_v22  ;;  %v2035_v20 = vld [vmem:[%s3501_s5 + $0x6c8] sm:$0xff] }
  0x7d   : > { %3065 = vmatmul.mubr.msk.bf16.gmra.mrb[48].mxu0 %vm306_vm1, %v294_v32  ;;  %v1403_v32 = vld [vmem:[%s3501_s5 + $0x190] sm:$0xff] }
  0x7e   : > { %3131 = vmatmul.mubr.msk.bf16.gmra.mrb[48].mxu1 %vm306_vm1, %v889_v33  ;;  %3068 = vmatprep.mubr.msk.bf16.mxu0 %vm306_vm1, %v295_v34  ;;  %v1404_v33 = vld [vmem:[%s3501_s5 + $0x198] sm:$0xff]  ;;  %v1996_v34 = vld [vmem:[%s3501_s5 + $0x1d0] sm:$0xff] }
  0x7f   : > { %3134 = vmatprep.mubr.msk.bf16.mxu1 %vm306_vm1, %v890_v35  ;;  %v1997_v35 = vld [vmem:[%s3501_s5 + $0x1d8] sm:$0xff]  ;;  %v1462_v40 = vpack.c.bf16 %v1404_v33, %v1403_v32  ;;  %v1425_v32 = vld [vmem:[%s3501_s5 + $0x480] sm:$0xff]  ;;  %v1426_v33 = vld [vmem:[%s3501_s5 + $0x488] sm:$0xff] }
  0x80   : > { %v2055_v41 = vpack.c.bf16 %v1997_v35, %v1996_v34  ;;  %v2018_v34 = vld [vmem:[%s3501_s5 + $0x4c0] sm:$0xff]  ;;  %v2019_v35 = vld [vmem:[%s3501_s5 + $0x4c8] sm:$0xff]  ;;  %v1473_v38 = vpack.c.bf16 %v1426_v33, %v1425_v32 }
  0x81   : > { %v2066_v39 = vpack.c.bf16 %v2019_v35, %v2018_v34  ;;  %v1443_v35 = vld [vmem:[%s3501_s5 + $0x690] sm:$0xff] }
  0x85   : > { %3069 = vmatmul.mubr.msk.bf16.gmra.mrb[52].mxu0 %vm306_vm1, %v296_v44  ;;  %v1407_v44 = vld [vmem:[%s3501_s5 + $0x1b0] sm:$0xff] }
  0x86   : > { %3135 = vmatmul.mubr.msk.bf16.gmra.mrb[52].mxu1 %vm306_vm1, %v891_v45  ;;  %3072 = vmatprep.mubr.msk.bf16.mxu0 %vm306_vm1, %v297_v46  ;;  %v1408_v45 = vld [vmem:[%s3501_s5 + $0x1b8] sm:$0xff]  ;;  %v2000_v46 = vld [vmem:[%s3501_s5 + $0x1f0] sm:$0xff] }
  0x87   : > { %3138 = vmatprep.mubr.msk.bf16.mxu1 %vm306_vm1, %v892_v47  ;;  %v2001_v47 = vld [vmem:[%s3501_s5 + $0x1f8] sm:$0xff]  ;;  %v1464_v52 = vpack.c.bf16 %v1408_v45, %v1407_v44  ;;  %v1429_v44 = vld [vmem:[%s3501_s5 + $0x4a0] sm:$0xff]  ;;  %v1430_v45 = vld [vmem:[%s3501_s5 + $0x4a8] sm:$0xff] }
  0x88   : > { %v2057_v53 = vpack.c.bf16 %v2001_v47, %v2000_v46  ;;  %v2022_v46 = vld [vmem:[%s3501_s5 + $0x4e0] sm:$0xff]  ;;  %v2023_v47 = vld [vmem:[%s3501_s5 + $0x4e8] sm:$0xff]  ;;  %v1475_v50 = vpack.c.bf16 %v1430_v45, %v1429_v44 }
  0x89   : > { %v2068_v51 = vpack.c.bf16 %v2023_v47, %v2022_v46  ;;  %v2038_v44 = vld [vmem:[%s3501_s5 + $0x6e0] sm:$0xff]  ;;  %v2039_v45 = vld [vmem:[%s3501_s5 + $0x6e8] sm:$0xff] }
  0x8d   : > { %3073 = vmatmul.mubr.msk.bf16.gmra.mrb[56].mxu0 %vm306_vm1, %v298_v56  ;;  %v1411_v56 = vld [vmem:[%s3501_s5 + $0x290] sm:$0xff] }
  0x8e   : > { %3139 = vmatmul.mubr.msk.bf16.gmra.mrb[56].mxu1 %vm306_vm1, %v893_v57  ;;  %3076 = vmatprep.mubr.msk.bf16.mxu0 %vm306_vm1, %v299_v58  ;;  %v1412_v57 = vld [vmem:[%s3501_s5 + $0x298] sm:$0xff]  ;;  %v2004_v58 = vld [vmem:[%s3501_s5 + $0x2d0] sm:$0xff] }
  0x8f   : > { %3142 = vmatprep.mubr.msk.bf16.mxu1 %vm306_vm1, %v894_v59  ;;  %v2005_v59 = vld [vmem:[%s3501_s5 + $0x2d8] sm:$0xff]  ;;  %v1466_v0 = vpack.c.bf16 %v1412_v57, %v1411_v56  ;;  %v1433_v56 = vld [vmem:[%s3501_s5 + $0x580] sm:$0xff]  ;;  %v1434_v57 = vld [vmem:[%s3501_s5 + $0x588] sm:$0xff] }
  0x90   : > { %v2059_v1 = vpack.c.bf16 %v2005_v59, %v2004_v58  ;;  %v2026_v58 = vld [vmem:[%s3501_s5 + $0x5c0] sm:$0xff]  ;;  %v2027_v59 = vld [vmem:[%s3501_s5 + $0x5c8] sm:$0xff]  ;;  %v1477_v62 = vpack.c.bf16 %v1434_v57, %v1433_v56 }
  0x91   : > { %v2070_v63 = vpack.c.bf16 %v2027_v59, %v2026_v58  ;;  %v2076_v58 = vpack.c.bf16 %v2039_v45, %v2038_v44 }
  0x95   : > { %3077 = vmatmul.mubr.msk.bf16.gmra.mrb[60].mxu0 %vm306_vm1, %v300_v4  ;;  %v1415_v4 = vld [vmem:[%s3501_s5 + $0x2b0] sm:$0xff] }
  0x96   : > { %3143 = vmatmul.mubr.msk.bf16.gmra.mrb[60].mxu1 %vm306_vm1, %v895_v5  ;;  %3148 = vmatprep.mubr.msk.bf16.mxu0 %vm306_vm1, %v1457_v6  ;;  %v1416_v5 = vld [vmem:[%s3501_s5 + $0x2b8] sm:$0xff]  ;;  %v2008_v6 = vld [vmem:[%s3501_s5 + $0x2f0] sm:$0xff] }
  0x97   : > { %3214 = vmatprep.mubr.msk.bf16.mxu1 %vm306_vm1, %v2050_v7  ;;  %v2009_v7 = vld [vmem:[%s3501_s5 + $0x2f8] sm:$0xff]  ;;  %v1468_v12 = vpack.c.bf16 %v1416_v5, %v1415_v4  ;;  %v1437_v4 = vld [vmem:[%s3501_s5 + $0x5a0] sm:$0xff]  ;;  %v1438_v5 = vld [vmem:[%s3501_s5 + $0x5a8] sm:$0xff] }
  0x98   : > { %v2061_v13 = vpack.c.bf16 %v2009_v7, %v2008_v6  ;;  %v2030_v6 = vld [vmem:[%s3501_s5 + $0x5e0] sm:$0xff]  ;;  %v2031_v7 = vld [vmem:[%s3501_s5 + $0x5e8] sm:$0xff]  ;;  %v1479_v10 = vpack.c.bf16 %v1438_v5, %v1437_v4 }
  0x99   : > { %v2072_v11 = vpack.c.bf16 %v2031_v7, %v2030_v6  ;;  %v1449_v4 = vld [vmem:[%s3501_s5 + $0x780] sm:$0xff]  ;;  %v1450_v5 = vld [vmem:[%s3501_s5 + $0x788] sm:$0xff] }
  0x9d   : > { %3149 = vmatmul.mubr.msk.bf16.vlgmr.msra.gmra.mrb[64].mxu0 %vm306_vm1, %v1458_v16  ;;  %v1419_v16 = vld [vmem:[%s3501_s5 + $0x390] sm:$0xff] }
  0x9e   : > { %3215 = vmatmul.mubr.msk.bf16.vlgmr.msra.gmra.mrb[64].mxu1 %vm306_vm1, %v2051_v17  ;;  %3152 = vmatprep.mubr.msk.bf16.mxu0 %vm306_vm1, %v1459_v18  ;;  %v1420_v17 = vld [vmem:[%s3501_s5 + $0x398] sm:$0xff]  ;;  %v2012_v18 = vld [vmem:[%s3501_s5 + $0x3d0] sm:$0xff] }
  0x9f   : > { %3218 = vmatprep.mubr.msk.bf16.mxu1 %vm306_vm1, %v2052_v19  ;;  %v2013_v19 = vld [vmem:[%s3501_s5 + $0x3d8] sm:$0xff]  ;;  %v1470_v24 = vpack.c.bf16 %v1420_v17, %v1419_v16  ;;  %v1441_v16 = vld [vmem:[%s3501_s5 + $0x680] sm:$0xff]  ;;  %v1442_v17 = vld [vmem:[%s3501_s5 + $0x688] sm:$0xff] }
  0xa0   : > { %v2063_v25 = vpack.c.bf16 %v2013_v19, %v2012_v18  ;;  %v2034_v19 = vld [vmem:[%s3501_s5 + $0x6c0] sm:$0xff] }
  0xa5   : > { %3153 = vmatmul.mubr.msk.bf16.gmra.mrb[68].mxu0 %vm306_vm1, %v1460_v28  ;;  %v1423_v28 = vld [vmem:[%s3501_s5 + $0x3b0] sm:$0xff] }
  0xa6   : > { %3219 = vmatmul.mubr.msk.bf16.gmra.mrb[68].mxu1 %vm306_vm1, %v2053_v29  ;;  %3156 = vmatprep.mubr.msk.bf16.mxu0 %vm306_vm1, %v1461_v30  ;;  %v1424_v29 = vld [vmem:[%s3501_s5 + $0x3b8] sm:$0xff]  ;;  %v2016_v30 = vld [vmem:[%s3501_s5 + $0x3f0] sm:$0xff] }
  0xa7   : > { %3222 = vmatprep.mubr.msk.bf16.mxu1 %vm306_vm1, %v2054_v31  ;;  %v2017_v31 = vld [vmem:[%s3501_s5 + $0x3f8] sm:$0xff]  ;;  %v1472_v36 = vpack.c.bf16 %v1424_v29, %v1423_v28 }
  0xa8   : > { %v2065_v37 = vpack.c.bf16 %v2017_v31, %v2016_v30  ;;  %v2074_v30 = vpack.c.bf16 %v2035_v20, %v2034_v19 }
  0xad   : > { %3157 = vmatmul.mubr.msk.bf16.gmra.mrb[72].mxu0 %vm306_vm1, %v1462_v40  ;;  %v1427_v40 = vld [vmem:[%s3501_s5 + $0x490] sm:$0xff] }
  0xae   : > { %3223 = vmatmul.mubr.msk.bf16.gmra.mrb[72].mxu1 %vm306_vm1, %v2055_v41  ;;  %3160 = vmatprep.mubr.msk.bf16.mxu0 %vm306_vm1, %v1463_v42  ;;  %v1428_v41 = vld [vmem:[%s3501_s5 + $0x498] sm:$0xff]  ;;  %v2020_v42 = vld [vmem:[%s3501_s5 + $0x4d0] sm:$0xff] }
  0xaf   : > { %3226 = vmatprep.mubr.msk.bf16.mxu1 %vm306_vm1, %v2056_v43  ;;  %v2021_v43 = vld [vmem:[%s3501_s5 + $0x4d8] sm:$0xff]  ;;  %v1474_v48 = vpack.c.bf16 %v1428_v41, %v1427_v40  ;;  %v1445_v40 = vld [vmem:[%s3501_s5 + $0x6a0] sm:$0xff]  ;;  %v1446_v41 = vld [vmem:[%s3501_s5 + $0x6a8] sm:$0xff] }
  0xb0   : > { %v2067_v49 = vpack.c.bf16 %v2021_v43, %v2020_v42 }
  0xb5   : > { %3161 = vmatmul.mubr.msk.bf16.gmra.mrb[76].mxu0 %vm306_vm1, %v1464_v52  ;;  %v1431_v52 = vld [vmem:[%s3501_s5 + $0x4b0] sm:$0xff] }
  0xb6   : > { %3227 = vmatmul.mubr.msk.bf16.gmra.mrb[76].mxu1 %vm306_vm1, %v2057_v53  ;;  %3164 = vmatprep.mubr.msk.bf16.mxu0 %vm306_vm1, %v1465_v54  ;;  %v1432_v53 = vld [vmem:[%s3501_s5 + $0x4b8] sm:$0xff]  ;;  %v2024_v54 = vld [vmem:[%s3501_s5 + $0x4f0] sm:$0xff] }
  0xb7   : > { %3230 = vmatprep.mubr.msk.bf16.mxu1 %vm306_vm1, %v2058_v55  ;;  %v2025_v55 = vld [vmem:[%s3501_s5 + $0x4f8] sm:$0xff]  ;;  %v1476_v60 = vpack.c.bf16 %v1432_v53, %v1431_v52 }
  0xb8   : > { %v2069_v61 = vpack.c.bf16 %v2025_v55, %v2024_v54  ;;  %v1483_v54 = vpack.c.bf16 %v1446_v41, %v1445_v40  ;;  %v2046_v41 = vld [vmem:[%s3501_s5 + $0x7e0] sm:$0xff] }
  0xbd   : > { %3165 = vmatmul.mubr.msk.bf16.gmra.mrb[80].mxu0 %vm306_vm1, %v1466_v0  ;;  %v1435_v0 = vld [vmem:[%s3501_s5 + $0x590] sm:$0xff] }
  0xbe   : > { %3231 = vmatmul.mubr.msk.bf16.gmra.mrb[80].mxu1 %vm306_vm1, %v2059_v1  ;;  %3168 = vmatprep.mubr.msk.bf16.mxu0 %vm306_vm1, %v1467_v2  ;;  %v1436_v1 = vld [vmem:[%s3501_s5 + $0x598] sm:$0xff]  ;;  %v2028_v2 = vld [vmem:[%s3501_s5 + $0x5d0] sm:$0xff] }
  0xbf   : > { %3234 = vmatprep.mubr.msk.bf16.mxu1 %vm306_vm1, %v2060_v3  ;;  %v2029_v3 = vld [vmem:[%s3501_s5 + $0x5d8] sm:$0xff]  ;;  %v1478_v8 = vpack.c.bf16 %v1436_v1, %v1435_v0  ;;  %v2040_v1 = vld [vmem:[%s3501_s5 + $0x6f0] sm:$0xff] }
  0xc0   : > { %v2071_v9 = vpack.c.bf16 %v2029_v3, %v2028_v2  ;;  %v1448_v0 = vld [vmem:[%s3501_s5 + $0x6b8] sm:$0xff] }
  0xc1   : > { %v2041_v3 = vld [vmem:[%s3501_s5 + $0x6f8] sm:$0xff] }
  0xc5   : > { %3169 = vmatmul.mubr.msk.bf16.gmra.mrb[84].mxu0 %vm306_vm1, %v1468_v12  ;;  %v1439_v12 = vld [vmem:[%s3501_s5 + $0x5b0] sm:$0xff] }
  0xc6   : > { %3235 = vmatmul.mubr.msk.bf16.gmra.mrb[84].mxu1 %vm306_vm1, %v2061_v13  ;;  %3172 = vmatprep.mubr.msk.bf16.mxu0 %vm306_vm1, %v1469_v14  ;;  %v1440_v13 = vld [vmem:[%s3501_s5 + $0x5b8] sm:$0xff]  ;;  %v2032_v14 = vld [vmem:[%s3501_s5 + $0x5f0] sm:$0xff] }
  0xc7   : > { %3238 = vmatprep.mubr.msk.bf16.mxu1 %vm306_vm1, %v2062_v15  ;;  %v2033_v15 = vld [vmem:[%s3501_s5 + $0x5f8] sm:$0xff]  ;;  %v1480_v23 = vpack.c.bf16 %v1440_v13, %v1439_v12 }
  0xcd   : > { %3173 = vmatmul.mubr.msk.bf16.gmra.mrb[88].mxu0 %vm306_vm1, %v1470_v24 }
  0xce   : > { %3239 = vmatmul.mubr.msk.bf16.gmra.mrb[88].mxu1 %vm306_vm1, %v2063_v25  ;;  %3176 = vmatprep.mubr.msk.bf16.mxu0 %vm306_vm1, %v1471_v26  ;;  %v2073_v26 = vpack.c.bf16 %v2033_v15, %v2032_v14 }
  0xcf   : > { %3242 = vmatprep.mubr.msk.bf16.mxu1 %vm306_vm1, %v2064_v27  ;;  %v1481_v27 = vpack.c.bf16 %v1442_v17, %v1441_v16  ;;  %v2077_v17 = vpack.c.bf16 %v2041_v3, %v2040_v1  ;;  %v1455_v1 = vld [vmem:[%s3501_s5 + $0x7b0] sm:$0xff] }
  0xd5   : > { %3177 = vmatmul.mubr.msk.bf16.gmra.mrb[92].mxu0 %vm306_vm1, %v1472_v36  ;;  %v1444_v36 = vld [vmem:[%s3501_s5 + $0x698] sm:$0xff] }
  0xd6   : > { %3243 = vmatmul.mubr.msk.bf16.gmra.mrb[92].mxu1 %vm306_vm1, %v2065_v37  ;;  %3180 = vmatprep.mubr.msk.bf16.mxu0 %vm306_vm1, %v1473_v38  ;;  %v2036_v37 = vld [vmem:[%s3501_s5 + $0x6d0] sm:$0xff] }
  0xd7   : > { %3246 = vmatprep.mubr.msk.bf16.mxu1 %vm306_vm1, %v2066_v39  ;;  %v2037_v39 = vld [vmem:[%s3501_s5 + $0x6d8] sm:$0xff] }
  0xd8   : > { %v2075_v53 = vpack.c.bf16 %v2037_v39, %v2036_v37  ;;  %v1454_v37 = vld [vmem:[%s3501_s5 + $0x7a8] sm:$0xff] }
  0xdd   : > { %3181 = vmatmul.mubr.msk.bf16.gmra.mrb[96].mxu0 %vm306_vm1, %v1474_v48 }
  0xde   : > { %3247 = vmatmul.mubr.msk.bf16.gmra.mrb[96].mxu1 %vm306_vm1, %v2067_v49  ;;  %3184 = vmatprep.mubr.msk.bf16.mxu0 %vm306_vm1, %v1475_v50  ;;  %v1482_v49 = vpack.c.bf16 %v1444_v36, %v1443_v35  ;;  %v2045_v35 = vld [vmem:[%s3501_s5 + $0x7d8] sm:$0xff]  ;;  %v1453_v36 = vld [vmem:[%s3501_s5 + $0x7a0] sm:$0xff] }
  0xdf   : > { %3250 = vmatprep.mubr.msk.bf16.mxu1 %vm306_vm1, %v2068_v51 }
  0xe5   : > { %3185 = vmatmul.mubr.msk.bf16.gmra.mrb[100].mxu0 %vm306_vm1, %v1476_v60 }
  0xe6   : > { %3251 = vmatmul.mubr.msk.bf16.gmra.mrb[100].mxu1 %vm306_vm1, %v2069_v61  ;;  %3188 = vmatprep.mubr.msk.bf16.mxu0 %vm306_vm1, %v1477_v62 }
  0xe7   : > { %3254 = vmatprep.mubr.msk.bf16.mxu1 %vm306_vm1, %v2070_v63  ;;  %v1447_v63 = vld [vmem:[%s3501_s5 + $0x6b0] sm:$0xff] }
  0xe8   : > { %v1484_v13 = vpack.c.bf16 %v1448_v0, %v1447_v63 }
  0xed   : > { %3189 = vmatmul.mubr.msk.bf16.gmra.mrb[104].mxu0 %vm306_vm1, %v1478_v8  ;;  %v2042_v8 = vld [vmem:[%s3501_s5 + $0x7c0] sm:$0xff] }
  0xee   : > { %3255 = vmatmul.mubr.msk.bf16.gmra.mrb[104].mxu1 %vm306_vm1, %v2071_v9  ;;  %3192 = vmatprep.mubr.msk.bf16.mxu0 %vm306_vm1, %v1479_v10  ;;  %v2043_v9 = vld [vmem:[%s3501_s5 + $0x7c8] sm:$0xff] }
  0xef   : > { %3258 = vmatprep.mubr.msk.bf16.mxu1 %vm306_vm1, %v2072_v11 }
  0xf0   : > { %v3018_v18 = vpop.f32.mrb[0].mxu0 }
  0xf1   : > { %v3084_v21 = vpop.f32.mrb[0].mxu1  ;;  %v441_v22 = vpop.f32.mrb[1].mxu0 }
  0xf2   : > { %v1026_v24 = vpop.f32.mrb[1].mxu1  ;;  %v3019_v25 = vpop.f32.mrb[2].mxu0 }
  0xf3   : > { %v3085_v28 = vpop.f32.mrb[2].mxu1  ;;  %v444_v29 = vpop.f32.mrb[3].mxu0 }
  0xf4   : > { %v696_v31 = vmax.f32 %v441_v22, %v444_v29  ;;  %v1029_v32 = vpop.f32.mrb[3].mxu1  ;;  %v2078_v22 = vpack.c.bf16 %v2043_v9, %v2042_v8 }
  0xf5   : > { %v1281_v33 = vmax.f32 %v1026_v24, %v1029_v32  ;;  %3193 = vmatmul.mubr.msk.bf16.gmra.mrb[108].mxu0 %vm306_vm1, %v1480_v23  ;;  %v2044_v32 = vld [vmem:[%s3501_s5 + $0x7d0] sm:$0xff] }
  0xf6   : > { %v697_v34 = vmax.f32 %v696_v31, %v3018_v18  ;;  %3259 = vmatmul.mubr.msk.bf16.gmra.mrb[108].mxu1 %vm306_vm1, %v2073_v26  ;;  %3196 = vmatprep.mubr.msk.bf16.mxu0 %vm306_vm1, %v1481_v27  ;;  %v1485_v18 = vpack.c.bf16 %v1450_v5, %v1449_v4  ;;  %v1452_v31 = vld [vmem:[%s3501_s5 + $0x798] sm:$0xff]  ;;  %v2048_v5 = vld [vmem:[%s3501_s5 + $0x7f0] sm:$0xff] }
  0xf7   : > { %v1282_v38 = vmax.f32 %v1281_v33, %v3084_v21  ;;  %3262 = vmatprep.mubr.msk.bf16.mxu1 %vm306_vm1, %v2074_v30  ;;  %v1451_v30 = vld [vmem:[%s3501_s5 + $0x790] sm:$0xff] }
  0xf8   : > { %v3022_v42 = vpop.f32.mrb[4].mxu0  ;;  %v698_v43 = vmax.f32 %v697_v34, %v3019_v25 }
  0xf9   : > { %v3088_v46 = vpop.f32.mrb[4].mxu1  ;;  %v457_v47 = vpop.f32.mrb[5].mxu0  ;;  %v1283_v48 = vmax.f32 %v1282_v38, %v3085_v28 }
  0xfa   : > { %v699_v50 = vmax.f32 %v698_v43, %v457_v47  ;;  %v1042_v51 = vpop.f32.mrb[5].mxu1  ;;  %v3023_v52 = vpop.f32.mrb[6].mxu0  ;;  %v1486_v47 = vpack.c.bf16 %v1452_v31, %v1451_v30 }
  0xfb   : > { %v1284_v55 = vmax.f32 %v1283_v48, %v1042_v51  ;;  %v3089_v56 = vpop.f32.mrb[6].mxu1  ;;  %v460_v57 = vpop.f32.mrb[7].mxu0 }
  0xfc   : > { %v700_v59 = vmax.f32 %v699_v50, %v460_v57  ;;  %v1045_v60 = vpop.f32.mrb[7].mxu1 }
  0xfd   : > { %v1285_v61 = vmax.f32 %v1284_v55, %v1045_v60  ;;  %3197 = vmatmul.mubr.msk.bf16.gmra.mrb[112].mxu0 %vm306_vm1, %v1482_v49 }
  0xfe   : > { %v701_v62 = vmax.f32 %v700_v59, %v3022_v42  ;;  %3263 = vmatmul.mubr.msk.bf16.gmra.mrb[112].mxu1 %vm306_vm1, %v2075_v53  ;;  %3200 = vmatprep.mubr.msk.bf16.mxu0 %vm306_vm1, %v1483_v54  ;;  %v2047_v42 = vld [vmem:[%s3501_s5 + $0x7e8] sm:$0xff]  ;;  %v1487_v53 = vpack.c.bf16 %v1454_v37, %v1453_v36 }
  0xff   : > { %v1286_v2 = vmax.f32 %v1285_v61, %v3088_v46  ;;  %3266 = vmatprep.mubr.msk.bf16.mxu1 %vm306_vm1, %v2076_v58  ;;  %v2080_v58 = vpack.c.bf16 %v2047_v42, %v2046_v41 }
 0x100   : > { %v702_v6 = vmax.f32 %v701_v62, %v3023_v52  ;;  %v3026_v7 = vpop.f32.mrb[8].mxu0  ;;  %v2079_v52 = vpack.c.bf16 %v2045_v35, %v2044_v32 }
 0x101   : > { %v1287_v10 = vmax.f32 %v1286_v2, %v3089_v56  ;;  %v3092_v11 = vpop.f32.mrb[8].mxu1  ;;  %v473_v12 = vpop.f32.mrb[9].mxu0  ;;  %v1456_v2 = vld [vmem:[%s3501_s5 + $0x7b8] sm:$0xff] }
 0x102   : > { %v703_v14 = vrot.slane %v702_v6, 4  ;;  %v1058_v15 = vpop.f32.mrb[9].mxu1  ;;  %v3027_v16 = vpop.f32.mrb[10].mxu0 }
 0x103   : > { %v1288_v19 = vrot.slane %v1287_v10, 4  ;;  %v3093_v20 = vpop.f32.mrb[10].mxu1  ;;  %v476_v21 = vpop.f32.mrb[11].mxu0 }
 0x104   : > { %v704_v23 = vmax.f32 %v702_v6, %v703_v14  ;;  %v709_v24 = vmax.f32 %v473_v12, %v476_v21  ;;  %v1061_v25 = vpop.f32.mrb[11].mxu1  ;;  %v2049_v6 = vld [vmem:[%s3501_s5 + $0x7f8] sm:$0xff]  ;;  %v1488_v12 = vpack.c.bf16 %v1456_v2, %v1455_v1 }
 0x105   : > { %v1289_v26 = vmax.f32 %v1287_v10, %v1288_v19  ;;  %v1294_v27 = vmax.f32 %v1058_v15, %v1061_v25  ;;  %3201 = vmatmul.mubr.msk.bf16.gmra.mrb[116].mxu0 %vm306_vm1, %v1484_v13 }
 0x106   : > { %v705_v28 = vrot.slane %v704_v23, 2  ;;  %v710_v29 = vmax.f32 %v709_v24, %v3026_v7  ;;  %3267 = vmatmul.mubr.msk.bf16.gmra.mrb[116].mxu1 %vm306_vm1, %v2077_v17  ;;  %3204 = vmatprep.mubr.msk.bf16.mxu0 %vm306_vm1, %v1485_v18 }
 0x107   : > { %v1290_v33 = vrot.slane %v1289_v26, 2  ;;  %v1295_v34 = vmax.f32 %v1294_v27, %v3092_v11  ;;  %3270 = vmatprep.mubr.msk.bf16.mxu1 %vm306_vm1, %v2078_v22 }
 0x108   : > { %v706_v38 = vmax.f32 %v704_v23, %v705_v28  ;;  %v3030_v39 = vpop.f32.mrb[12].mxu0  ;;  %v711_v40 = vmax.f32 %v710_v29, %v3027_v16  ;;  %v2081_v16 = vpack.c.bf16 %v2049_v6, %v2048_v5 }
 0x109   : > { %v1291_v43 = vmax.f32 %v1289_v26, %v1290_v33  ;;  %v3096_v44 = vpop.f32.mrb[12].mxu1  ;;  %v489_v45 = vpop.f32.mrb[13].mxu0  ;;  %v1296_v46 = vmax.f32 %v1295_v34, %v3093_v20 }
 0x10a   : > { %v707_v48 = vrot.slane %v706_v38, 1  ;;  %v712_v49 = vmax.f32 %v711_v40, %v489_v45  ;;  %v1074_v50 = vpop.f32.mrb[13].mxu1  ;;  %v3031_v51 = vpop.f32.mrb[14].mxu0 }
 0x10b   : > { %v1292_v54 = vrot.slane %v1291_v43, 1  ;;  %v1297_v55 = vmax.f32 %v1296_v46, %v1074_v50  ;;  %v3097_v56 = vpop.f32.mrb[14].mxu1  ;;  %v492_v57 = vpop.f32.mrb[15].mxu0 }
 0x10c   : > { %v3877_v59 = vmax.f32 %v706_v38, %v707_v48  ;;  %v713_v60 = vmax.f32 %v712_v49, %v492_v57  ;;  %v1077_v61 = vpop.f32.mrb[15].mxu1 }
 0x10d   : > { %v3879_v62 = vmax.f32 %v1291_v43, %v1292_v54  ;;  %v1298_v63 = vmax.f32 %v1297_v55, %v1077_v61  ;;  %3205 = vmatmul.mubr.msk.bf16.gmra.mrb[120].mxu0 %vm306_vm1, %v1486_v47 }
 0x10e   : > { %v714_v0 = vmax.f32 %v713_v60, %v3030_v39  ;;  %3271 = vmatmul.mubr.msk.bf16.gmra.mrb[120].mxu1 %vm306_vm1, %v2079_v52  ;;  %3208 = vmatprep.mubr.msk.bf16.mxu0 %vm306_vm1, %v1487_v53 }
 0x10f   : > { %v1385_v3 = vmax.f32 %v3877_v59, %v3879_v62  ;;  %v1299_v4 = vmax.f32 %v1298_v63, %v3096_v44  ;;  %3274 = vmatprep.mubr.msk.bf16.mxu1 %vm306_vm1, %v2080_v58 }
 0x110   : > { %v715_v7 = vmax.f32 %v714_v0, %v3031_v51  ;;  %v3034_v8 = vpop.f32.mrb[16].mxu0 }
 0x111   : > { %v1300_v9 = vmax.f32 %v1299_v4, %v3097_v56  ;;  %v3100_v10 = vpop.f32.mrb[16].mxu1  ;;  %v505_v11 = vpop.f32.mrb[17].mxu0 }
 0x112   : > { %v716_v13 = vrot.slane %v715_v7, 4  ;;  %v1090_v14 = vpop.f32.mrb[17].mxu1  ;;  %v3035_v15 = vpop.f32.mrb[18].mxu0 }
 0x113   : > { %v1301_v17 = vrot.slane %v1300_v9, 4  ;;  %v3101_v18 = vpop.f32.mrb[18].mxu1  ;;  %v508_v19 = vpop.f32.mrb[19].mxu0 }
 0x114   : > { %v717_v20 = vmax.f32 %v715_v7, %v716_v13  ;;  %v722_v21 = vmax.f32 %v505_v11, %v508_v19  ;;  %v1093_v22 = vpop.f32.mrb[19].mxu1 }
 0x115   : > { %v1302_v23 = vmax.f32 %v1300_v9, %v1301_v17  ;;  %v1307_v24 = vmax.f32 %v1090_v14, %v1093_v22  ;;  %3209 = vmatmul.mubr.msk.bf16.gmra.mrb[124].mxu0 %vm306_vm1, %v1488_v12 }
 0x116   : > { %v718_v25 = vrot.slane %v717_v20, 2  ;;  %v723_v26 = vmax.f32 %v722_v21, %v3034_v8  ;;  %3275 = vmatmul.mubr.msk.bf16.gmra.mrb[124].mxu1 %vm306_vm1, %v2081_v16 }
 0x117   : > { %v1303_v27 = vrot.slane %v1302_v23, 2  ;;  %v1308_v28 = vmax.f32 %v1307_v24, %v3100_v10 }
 0x118   : > { %v719_v29 = vmax.f32 %v717_v20, %v718_v25  ;;  %v3038_v30 = vpop.f32.mrb[20].mxu0  ;;  %v724_v31 = vmax.f32 %v723_v26, %v3035_v15 }
 0x119   : > { %v1304_v32 = vmax.f32 %v1302_v23, %v1303_v27  ;;  %v3104_v33 = vpop.f32.mrb[20].mxu1  ;;  %v521_v34 = vpop.f32.mrb[21].mxu0  ;;  %v1309_v35 = vmax.f32 %v1308_v28, %v3101_v18 }
 0x11a   : > { %v720_v36 = vrot.slane %v719_v29, 1  ;;  %v725_v37 = vmax.f32 %v724_v31, %v521_v34  ;;  %v1106_v38 = vpop.f32.mrb[21].mxu1  ;;  %v3039_v39 = vpop.f32.mrb[22].mxu0 }
 0x11b   : > { %v1305_v40 = vrot.slane %v1304_v32, 1  ;;  %v1310_v41 = vmax.f32 %v1309_v35, %v1106_v38  ;;  %v3105_v42 = vpop.f32.mrb[22].mxu1  ;;  %v524_v43 = vpop.f32.mrb[23].mxu0 }
 0x11c   : > { %v3893_v44 = vmax.f32 %v719_v29, %v720_v36  ;;  %v726_v45 = vmax.f32 %v725_v37, %v524_v43  ;;  %v1109_v46 = vpop.f32.mrb[23].mxu1 }
 0x11d   : > { %v3895_v47 = vmax.f32 %v1304_v32, %v1305_v40  ;;  %v1311_v48 = vmax.f32 %v1310_v41, %v1109_v46 }
 0x11e   : > { %v727_v49 = vmax.f32 %v726_v45, %v3038_v30 }
 0x11f   : > { %v1386_v50 = vmax.f32 %v3893_v44, %v3895_v47  ;;  %v1312_v51 = vmax.f32 %v1311_v48, %v3104_v33 }
 0x120   : > { %v728_v52 = vmax.f32 %v727_v49, %v3039_v39  ;;  %v3042_v53 = vpop.f32.mrb[24].mxu0 }
 0x121   : > { %v1313_v54 = vmax.f32 %v1312_v51, %v3105_v42  ;;  %v3108_v55 = vpop.f32.mrb[24].mxu1  ;;  %v537_v56 = vpop.f32.mrb[25].mxu0 }
 0x122   : > { %v729_v57 = vrot.slane %v728_v52, 4  ;;  %v1122_v58 = vpop.f32.mrb[25].mxu1  ;;  %v3043_v60 = vpop.f32.mrb[26].mxu0 }
 0x123   : > { %v1314_v61 = vrot.slane %v1313_v54, 4  ;;  %v3109_v63 = vpop.f32.mrb[26].mxu1  ;;  %v540_v0 = vpop.f32.mrb[27].mxu0 }
 0x124   : > { %v730_v1 = vmax.f32 %v728_v52, %v729_v57  ;;  %v735_v2 = vmax.f32 %v537_v56, %v540_v0  ;;  %v1125_v4 = vpop.f32.mrb[27].mxu1 }
 0x125   : > { %v1315_v5 = vmax.f32 %v1313_v54, %v1314_v61  ;;  %v1320_v6 = vmax.f32 %v1122_v58, %v1125_v4 }
 0x126   : > { %v731_v7 = vrot.slane %v730_v1, 2  ;;  %v736_v8 = vmax.f32 %v735_v2, %v3042_v53 }
 0x127   : > { %v1316_v9 = vrot.slane %v1315_v5, 2  ;;  %v1321_v10 = vmax.f32 %v1320_v6, %v3108_v55 }
 0x128   : > { %v732_v11 = vmax.f32 %v730_v1, %v731_v7  ;;  %v3046_v12 = vpop.f32.mrb[28].mxu0  ;;  %v737_v13 = vmax.f32 %v736_v8, %v3043_v60 }
 0x129   : > { %v1317_v14 = vmax.f32 %v1315_v5, %v1316_v9  ;;  %v3112_v15 = vpop.f32.mrb[28].mxu1  ;;  %v553_v16 = vpop.f32.mrb[29].mxu0  ;;  %v1322_v17 = vmax.f32 %v1321_v10, %v3109_v63 }
 0x12a   : > { %v733_v18 = vrot.slane %v732_v11, 1  ;;  %v738_v19 = vmax.f32 %v737_v13, %v553_v16  ;;  %v1138_v20 = vpop.f32.mrb[29].mxu1  ;;  %v3047_v21 = vpop.f32.mrb[30].mxu0 }
 0x12b   : > { %v1318_v22 = vrot.slane %v1317_v14, 1  ;;  %v1323_v23 = vmax.f32 %v1322_v17, %v1138_v20  ;;  %v3113_v24 = vpop.f32.mrb[30].mxu1  ;;  %v556_v25 = vpop.f32.mrb[31].mxu0 }
 0x12c   : > { %v3899_v26 = vmax.f32 %v732_v11, %v733_v18  ;;  %v739_v27 = vmax.f32 %v738_v19, %v556_v25  ;;  %v1141_v28 = vpop.f32.mrb[31].mxu1 }
 0x12d   : > { %v3901_v29 = vmax.f32 %v1317_v14, %v1318_v22  ;;  %v1324_v30 = vmax.f32 %v1323_v23, %v1141_v28 }
 0x12e   : > { %v740_v31 = vmax.f32 %v739_v27, %v3046_v12 }
 0x12f   : > { %v1387_v32 = vmax.f32 %v3899_v26, %v3901_v29  ;;  %v1325_v33 = vmax.f32 %v1324_v30, %v3112_v15 }
 0x130   : > { %v741_v34 = vmax.f32 %v740_v31, %v3047_v21  ;;  %v3050_v35 = vpop.f32.mrb[32].mxu0 }
 0x131   : > { %v1326_v36 = vmax.f32 %v1325_v33, %v3113_v24  ;;  %v3116_v37 = vpop.f32.mrb[32].mxu1  ;;  %v569_v38 = vpop.f32.mrb[33].mxu0 }
 0x132   : > { %v742_v39 = vrot.slane %v741_v34, 4  ;;  %v1154_v40 = vpop.f32.mrb[33].mxu1  ;;  %v3051_v41 = vpop.f32.mrb[34].mxu0 }
 0x133   : > { %v1327_v42 = vrot.slane %v1326_v36, 4  ;;  %v3117_v43 = vpop.f32.mrb[34].mxu1  ;;  %v572_v45 = vpop.f32.mrb[35].mxu0 }
 0x134   : > { %v743_v46 = vmax.f32 %v741_v34, %v742_v39  ;;  %v748_v48 = vmax.f32 %v569_v38, %v572_v45  ;;  %v1157_v49 = vpop.f32.mrb[35].mxu1 }
 0x135   : > { %v1328_v51 = vmax.f32 %v1326_v36, %v1327_v42  ;;  %v1333_v52 = vmax.f32 %v1154_v40, %v1157_v49 }
 0x136   : > { %v744_v53 = vrot.slane %v743_v46, 2  ;;  %v749_v54 = vmax.f32 %v748_v48, %v3050_v35 }
 0x137   : > { %v1329_v55 = vrot.slane %v1328_v51, 2  ;;  %v1334_v56 = vmax.f32 %v1333_v52, %v3116_v37 }
 0x138   : > { %v745_v57 = vmax.f32 %v743_v46, %v744_v53  ;;  %v3054_v58 = vpop.f32.mrb[36].mxu0  ;;  %v750_v60 = vmax.f32 %v749_v54, %v3051_v41 }
 0x139   : > { %v1330_v61 = vmax.f32 %v1328_v51, %v1329_v55  ;;  %v3120_v63 = vpop.f32.mrb[36].mxu1  ;;  %v585_v0 = vpop.f32.mrb[37].mxu0  ;;  %v1335_v1 = vmax.f32 %v1334_v56, %v3117_v43 }
 0x13a   : > { %v746_v2 = vrot.slane %v745_v57, 1  ;;  %v751_v4 = vmax.f32 %v750_v60, %v585_v0  ;;  %v1170_v5 = vpop.f32.mrb[37].mxu1  ;;  %v3055_v6 = vpop.f32.mrb[38].mxu0 }
 0x13b   : > { %v1331_v7 = vrot.slane %v1330_v61, 1  ;;  %v1336_v8 = vmax.f32 %v1335_v1, %v1170_v5  ;;  %v3121_v9 = vpop.f32.mrb[38].mxu1  ;;  %v588_v10 = vpop.f32.mrb[39].mxu0 }
 0x13c   : > { %v3905_v11 = vmax.f32 %v745_v57, %v746_v2  ;;  %v752_v12 = vmax.f32 %v751_v4, %v588_v10  ;;  %v1173_v13 = vpop.f32.mrb[39].mxu1 }
 0x13d   : > { %v3907_v14 = vmax.f32 %v1330_v61, %v1331_v7  ;;  %v1337_v15 = vmax.f32 %v1336_v8, %v1173_v13 }
 0x13e   : > { %v753_v16 = vmax.f32 %v752_v12, %v3054_v58 }
 0x13f   : > { %v1388_v17 = vmax.f32 %v3905_v11, %v3907_v14  ;;  %v1338_v18 = vmax.f32 %v1337_v15, %v3120_v63 }
 0x140   : > { %v754_v19 = vmax.f32 %v753_v16, %v3055_v6  ;;  %v3058_v20 = vpop.f32.mrb[40].mxu0 }
 0x141   : > { %v1339_v21 = vmax.f32 %v1338_v18, %v3121_v9  ;;  %v3124_v22 = vpop.f32.mrb[40].mxu1  ;;  %v601_v23 = vpop.f32.mrb[41].mxu0 }
 0x142   : > { %v755_v24 = vrot.slane %v754_v19, 4  ;;  %v1186_v25 = vpop.f32.mrb[41].mxu1  ;;  %v3059_v27 = vpop.f32.mrb[42].mxu0 }
 0x143   : > { %v1340_v28 = vrot.slane %v1339_v21, 4  ;;  %v3125_v30 = vpop.f32.mrb[42].mxu1  ;;  %v604_v31 = vpop.f32.mrb[43].mxu0 }
 0x144   : > { %v756_v33 = vmax.f32 %v754_v19, %v755_v24  ;;  %v761_v34 = vmax.f32 %v601_v23, %v604_v31  ;;  %v1189_v35 = vpop.f32.mrb[43].mxu1 }
 0x145   : > { %v1341_v36 = vmax.f32 %v1339_v21, %v1340_v28  ;;  %v1346_v37 = vmax.f32 %v1186_v25, %v1189_v35 }
 0x146   : > { %v757_v38 = vrot.slane %v756_v33, 2  ;;  %v762_v39 = vmax.f32 %v761_v34, %v3058_v20 }
 0x147   : > { %v1342_v40 = vrot.slane %v1341_v36, 2  ;;  %v1347_v41 = vmax.f32 %v1346_v37, %v3124_v22 }
 0x148   : > { %v758_v42 = vmax.f32 %v756_v33, %v757_v38  ;;  %v3062_v43 = vpop.f32.mrb[44].mxu0  ;;  %v763_v45 = vmax.f32 %v762_v39, %v3059_v27 }
 0x149   : > { %v1343_v46 = vmax.f32 %v1341_v36, %v1342_v40  ;;  %v3128_v48 = vpop.f32.mrb[44].mxu1  ;;  %v617_v49 = vpop.f32.mrb[45].mxu0  ;;  %v1348_v51 = vmax.f32 %v1347_v41, %v3125_v30 }
 0x14a   : > { %v759_v52 = vrot.slane %v758_v42, 1  ;;  %v764_v53 = vmax.f32 %v763_v45, %v617_v49  ;;  %v1202_v54 = vpop.f32.mrb[45].mxu1  ;;  %v3063_v55 = vpop.f32.mrb[46].mxu0 }
 0x14b   : > { %v1344_v56 = vrot.slane %v1343_v46, 1  ;;  %v1349_v57 = vmax.f32 %v1348_v51, %v1202_v54  ;;  %v3129_v58 = vpop.f32.mrb[46].mxu1  ;;  %v620_v60 = vpop.f32.mrb[47].mxu0 }
 0x14c   : > { %v3911_v61 = vmax.f32 %v758_v42, %v759_v52  ;;  %v765_v63 = vmax.f32 %v764_v53, %v620_v60  ;;  %v1205_v0 = vpop.f32.mrb[47].mxu1 }
 0x14d   : > { %v3913_v1 = vmax.f32 %v1343_v46, %v1344_v56  ;;  %v1350_v2 = vmax.f32 %v1349_v57, %v1205_v0 }
 0x14e   : > { %v766_v4 = vmax.f32 %v765_v63, %v3062_v43 }
 0x14f   : > { %v1389_v5 = vmax.f32 %v3911_v61, %v3913_v1  ;;  %v1351_v6 = vmax.f32 %v1350_v2, %v3128_v48 }
 0x150   : > { %v767_v7 = vmax.f32 %v766_v4, %v3063_v55  ;;  %v3066_v8 = vpop.f32.mrb[48].mxu0 }
 0x151   : > { %v1352_v9 = vmax.f32 %v1351_v6, %v3129_v58  ;;  %v3132_v10 = vpop.f32.mrb[48].mxu1  ;;  %v633_v12 = vpop.f32.mrb[49].mxu0 }
 0x152   : > { %v768_v13 = vrot.slane %v767_v7, 4  ;;  %v1218_v15 = vpop.f32.mrb[49].mxu1  ;;  %v3067_v16 = vpop.f32.mrb[50].mxu0 }
 0x153   : > { %v1353_v18 = vrot.slane %v1352_v9, 4  ;;  %v3133_v19 = vpop.f32.mrb[50].mxu1  ;;  %v636_v20 = vpop.f32.mrb[51].mxu0 }
 0x154   : > { %v769_v21 = vmax.f32 %v767_v7, %v768_v13  ;;  %v774_v22 = vmax.f32 %v633_v12, %v636_v20  ;;  %v1221_v23 = vpop.f32.mrb[51].mxu1 }
 0x155   : > { %v1354_v24 = vmax.f32 %v1352_v9, %v1353_v18  ;;  %v1359_v25 = vmax.f32 %v1218_v15, %v1221_v23 }
 0x156   : > { %v770_v27 = vrot.slane %v769_v21, 2  ;;  %v775_v28 = vmax.f32 %v774_v22, %v3066_v8 }
 0x157   : > { %v1355_v30 = vrot.slane %v1354_v24, 2  ;;  %v1360_v31 = vmax.f32 %v1359_v25, %v3132_v10 }
 0x158   : > { %v771_v33 = vmax.f32 %v769_v21, %v770_v27  ;;  %v3070_v34 = vpop.f32.mrb[52].mxu0  ;;  %v776_v35 = vmax.f32 %v775_v28, %v3067_v16 }
 0x159   : > { %v1356_v36 = vmax.f32 %v1354_v24, %v1355_v30  ;;  %v3136_v37 = vpop.f32.mrb[52].mxu1  ;;  %v649_v38 = vpop.f32.mrb[53].mxu0  ;;  %v1361_v39 = vmax.f32 %v1360_v31, %v3133_v19 }
 0x15a   : > { %v772_v40 = vrot.slane %v771_v33, 1  ;;  %v777_v41 = vmax.f32 %v776_v35, %v649_v38  ;;  %v1234_v42 = vpop.f32.mrb[53].mxu1  ;;  %v3071_v43 = vpop.f32.mrb[54].mxu0 }
 0x15b   : > { %v1357_v45 = vrot.slane %v1356_v36, 1  ;;  %v1362_v46 = vmax.f32 %v1361_v39, %v1234_v42  ;;  %v3137_v48 = vpop.f32.mrb[54].mxu1  ;;  %v652_v49 = vpop.f32.mrb[55].mxu0 }
 0x15c   : > { %v3917_v51 = vmax.f32 %v771_v33, %v772_v40  ;;  %v778_v52 = vmax.f32 %v777_v41, %v652_v49  ;;  %v1237_v53 = vpop.f32.mrb[55].mxu1 }
 0x15d   : > { %v3919_v54 = vmax.f32 %v1356_v36, %v1357_v45  ;;  %v1363_v55 = vmax.f32 %v1362_v46, %v1237_v53 }
 0x15e   : > { %v779_v56 = vmax.f32 %v778_v52, %v3070_v34 }
 0x15f   : > { %v1390_v57 = vmax.f32 %v3917_v51, %v3919_v54  ;;  %v1364_v58 = vmax.f32 %v1363_v55, %v3136_v37 }
 0x160   : > { %v780_v60 = vmax.f32 %v779_v56, %v3071_v43  ;;  %v3074_v63 = vpop.f32.mrb[56].mxu0 }
 0x161   : > { %v1365_v0 = vmax.f32 %v1364_v58, %v3137_v48  ;;  %v3140_v2 = vpop.f32.mrb[56].mxu1  ;;  %v665_v4 = vpop.f32.mrb[57].mxu0 }
 0x162   : > { %v781_v6 = vrot.slane %v780_v60, 4  ;;  %v1250_v7 = vpop.f32.mrb[57].mxu1  ;;  %v3075_v8 = vpop.f32.mrb[58].mxu0 }
 0x163   : > { %v1366_v9 = vrot.slane %v1365_v0, 4  ;;  %v3141_v10 = vpop.f32.mrb[58].mxu1  ;;  %v668_v12 = vpop.f32.mrb[59].mxu0 }
 0x164   : > { %v782_v13 = vmax.f32 %v780_v60, %v781_v6  ;;  %v787_v15 = vmax.f32 %v665_v4, %v668_v12  ;;  %v1253_v16 = vpop.f32.mrb[59].mxu1 }
 0x165   : > { %v1367_v18 = vmax.f32 %v1365_v0, %v1366_v9  ;;  %v1372_v19 = vmax.f32 %v1250_v7, %v1253_v16 }
 0x166   : > { %v783_v20 = vrot.slane %v782_v13, 2  ;;  %v788_v21 = vmax.f32 %v787_v15, %v3074_v63 }
 0x167   : > { %v1368_v22 = vrot.slane %v1367_v18, 2  ;;  %v1373_v23 = vmax.f32 %v1372_v19, %v3140_v2 }
 0x168   : > { %v784_v24 = vmax.f32 %v782_v13, %v783_v20  ;;  %v3078_v25 = vpop.f32.mrb[60].mxu0  ;;  %v789_v27 = vmax.f32 %v788_v21, %v3075_v8 }
 0x169   : > { %v1369_v28 = vmax.f32 %v1367_v18, %v1368_v22  ;;  %v3144_v30 = vpop.f32.mrb[60].mxu1  ;;  %v681_v31 = vpop.f32.mrb[61].mxu0  ;;  %v1374_v33 = vmax.f32 %v1373_v23, %v3141_v10 }
 0x16a   : > { %v785_v34 = vrot.slane %v784_v24, 1  ;;  %v790_v35 = vmax.f32 %v789_v27, %v681_v31  ;;  %v1266_v36 = vpop.f32.mrb[61].mxu1  ;;  %v3079_v37 = vpop.f32.mrb[62].mxu0 }
 0x16b   : > { %v1370_v38 = vrot.slane %v1369_v28, 1  ;;  %v1375_v39 = vmax.f32 %v1374_v33, %v1266_v36  ;;  %v3145_v40 = vpop.f32.mrb[62].mxu1  ;;  %v684_v41 = vpop.f32.mrb[63].mxu0 }
 0x16c   : > { %v3923_v42 = vmax.f32 %v784_v24, %v785_v34  ;;  %v791_v43 = vmax.f32 %v790_v35, %v684_v41  ;;  %v1269_v45 = vpop.f32.mrb[63].mxu1 }
 0x16d   : > { %v3925_v46 = vmax.f32 %v1369_v28, %v1370_v38  ;;  %v1376_v48 = vmax.f32 %v1375_v39, %v1269_v45 }
 0x16e   : > { %v792_v49 = vmax.f32 %v791_v43, %v3078_v25 }
 0x16f   : > { %v1391_v52 = vmax.f32 %v3923_v42, %v3925_v46  ;;  %v1377_v53 = vmax.f32 %v1376_v48, %v3144_v30 }
 0x170   : > { %v793_v55 = vmax.f32 %v792_v49, %v3079_v37  ;;  %v3150_v56 = vpop.f32.mrb[64].mxu0 }
 0x171   : > { %v1378_v58 = vmax.f32 %v1377_v53, %v3145_v40  ;;  %v3216_v60 = vpop.f32.mrb[64].mxu1  ;;  %v1619_v63 = vpop.f32.mrb[65].mxu0 }
 0x172   : > { %v794_v0 = vrot.slane %v793_v55, 4  ;;  %v2212_v2 = vpop.f32.mrb[65].mxu1  ;;  %v3151_v4 = vpop.f32.mrb[66].mxu0 }
 0x173   : > { %v1379_v6 = vrot.slane %v1378_v58, 4  ;;  %v3217_v7 = vpop.f32.mrb[66].mxu1  ;;  %v1622_v8 = vpop.f32.mrb[67].mxu0 }
 0x174   : > { %v795_v9 = vmax.f32 %v793_v55, %v794_v0  ;;  %v1874_v10 = vmax.f32 %v1619_v63, %v1622_v8  ;;  %v2215_v12 = vpop.f32.mrb[67].mxu1 }
 0x175   : > { %v1380_v13 = vmax.f32 %v1378_v58, %v1379_v6  ;;  %v2467_v15 = vmax.f32 %v2212_v2, %v2215_v12 }
 0x176   : > { %v796_v16 = vrot.slane %v795_v9, 2  ;;  %v1875_v18 = vmax.f32 %v1874_v10, %v3150_v56 }
 0x177   : > { %v1381_v19 = vrot.slane %v1380_v13, 2  ;;  %v2468_v20 = vmax.f32 %v2467_v15, %v3216_v60 }
 0x178   : > { %v797_v21 = vmax.f32 %v795_v9, %v796_v16  ;;  %v3154_v22 = vpop.f32.mrb[68].mxu0  ;;  %v1876_v23 = vmax.f32 %v1875_v18, %v3151_v4 }
 0x179   : > { %v1382_v24 = vmax.f32 %v1380_v13, %v1381_v19  ;;  %v3220_v25 = vpop.f32.mrb[68].mxu1  ;;  %v1635_v27 = vpop.f32.mrb[69].mxu0  ;;  %v2469_v28 = vmax.f32 %v2468_v20, %v3217_v7 }
 0x17a   : > { %v798_v30 = vrot.slane %v797_v21, 1  ;;  %v1877_v31 = vmax.f32 %v1876_v23, %v1635_v27  ;;  %v2228_v33 = vpop.f32.mrb[69].mxu1  ;;  %v3155_v34 = vpop.f32.mrb[70].mxu0 }
 0x17b   : > { %v1383_v35 = vrot.slane %v1382_v24, 1  ;;  %v2470_v36 = vmax.f32 %v2469_v28, %v2228_v33  ;;  %v3221_v37 = vpop.f32.mrb[70].mxu1  ;;  %v1638_v38 = vpop.f32.mrb[71].mxu0 }
 0x17c   : > { %v3929_v39 = vmax.f32 %v797_v21, %v798_v30  ;;  %v1878_v40 = vmax.f32 %v1877_v31, %v1638_v38  ;;  %v2231_v41 = vpop.f32.mrb[71].mxu1 }
 0x17d   : > { %v3931_v43 = vmax.f32 %v1382_v24, %v1383_v35  ;;  %v2471_v45 = vmax.f32 %v2470_v36, %v2231_v41 }
 0x17e   : > { %v1879_v48 = vmax.f32 %v1878_v40, %v3154_v22 }
 0x17f   : > { %v1392_v49 = vmax.f32 %v3929_v39, %v3931_v43  ;;  %v2472_v53 = vmax.f32 %v2471_v45, %v3220_v25 }
 0x180   : > { %v1880_v55 = vmax.f32 %v1879_v48, %v3155_v34  ;;  %v3158_v56 = vpop.f32.mrb[72].mxu0 }
 0x181   : > { %v2473_v58 = vmax.f32 %v2472_v53, %v3221_v37  ;;  %v3224_v60 = vpop.f32.mrb[72].mxu1  ;;  %v1651_v63 = vpop.f32.mrb[73].mxu0 }
 0x182   : > { %v1881_v0 = vrot.slane %v1880_v55, 4  ;;  %v2244_v2 = vpop.f32.mrb[73].mxu1  ;;  %v3159_v4 = vpop.f32.mrb[74].mxu0 }
 0x183   : > { %v2474_v6 = vrot.slane %v2473_v58, 4  ;;  %v3225_v7 = vpop.f32.mrb[74].mxu1  ;;  %v1654_v8 = vpop.f32.mrb[75].mxu0 }
 0x184   : > { %v1882_v9 = vmax.f32 %v1880_v55, %v1881_v0  ;;  %v1887_v10 = vmax.f32 %v1651_v63, %v1654_v8  ;;  %v2247_v12 = vpop.f32.mrb[75].mxu1 }
 0x185   : > { %v2475_v13 = vmax.f32 %v2473_v58, %v2474_v6  ;;  %v2480_v15 = vmax.f32 %v2244_v2, %v2247_v12 }
 0x186   : > { %v1883_v16 = vrot.slane %v1882_v9, 2  ;;  %v1888_v18 = vmax.f32 %v1887_v10, %v3158_v56 }
 0x187   : > { %v2476_v19 = vrot.slane %v2475_v13, 2  ;;  %v2481_v20 = vmax.f32 %v2480_v15, %v3224_v60 }
 0x188   : > { %v1884_v21 = vmax.f32 %v1882_v9, %v1883_v16  ;;  %v3162_v22 = vpop.f32.mrb[76].mxu0  ;;  %v1889_v23 = vmax.f32 %v1888_v18, %v3159_v4 }
 0x189   : > { %v2477_v24 = vmax.f32 %v2475_v13, %v2476_v19  ;;  %v3228_v25 = vpop.f32.mrb[76].mxu1  ;;  %v1667_v27 = vpop.f32.mrb[77].mxu0  ;;  %v2482_v28 = vmax.f32 %v2481_v20, %v3225_v7 }
 0x18a   : > { %v1885_v30 = vrot.slane %v1884_v21, 1  ;;  %v1890_v31 = vmax.f32 %v1889_v23, %v1667_v27  ;;  %v2260_v33 = vpop.f32.mrb[77].mxu1  ;;  %v3163_v34 = vpop.f32.mrb[78].mxu0 }
 0x18b   : > { %v2478_v35 = vrot.slane %v2477_v24, 1  ;;  %v2483_v36 = vmax.f32 %v2482_v28, %v2260_v33  ;;  %v3229_v37 = vpop.f32.mrb[78].mxu1  ;;  %v1670_v38 = vpop.f32.mrb[79].mxu0 }
 0x18c   : > { %v1886_v40 = vmax.f32 %v1884_v21, %v1885_v30  ;;  %v1891_v41 = vmax.f32 %v1890_v31, %v1670_v38  ;;  %v2263_v45 = vpop.f32.mrb[79].mxu1 }
 0x18d   : > { %v2484_v48 = vmax.f32 %v2483_v36, %v2263_v45  ;;  %v2479_v55 = vmax.f32 %v2477_v24, %v2478_v35 }
 0x18e   : > { %v1978_v53 = vmax.f32 %v1385_v3, %v1886_v40  ;;  %v1892_v56 = vmax.f32 %v1891_v41, %v3162_v22 }
 0x18f   : > { %v2485_v58 = vmax.f32 %v2484_v48, %v3228_v25 }
 0x190   : > { %v2571_v60 = vmax.f32 %v1978_v53, %v2479_v55  ;;  %v1893_v63 = vmax.f32 %v1892_v56, %v3163_v34  ;;  %v3166_v0 = vpop.f32.mrb[80].mxu0 }
 0x191   : > { %v2486_v2 = vmax.f32 %v2485_v58, %v3229_v37  ;;  %v3232_v4 = vpop.f32.mrb[80].mxu1  ;;  %v1683_v6 = vpop.f32.mrb[81].mxu0 }
 0x192   : > { %v1894_v7 = vrot.slane %v1893_v63, 4  ;;  %v2276_v8 = vpop.f32.mrb[81].mxu1  ;;  %v3167_v9 = vpop.f32.mrb[82].mxu0 }
 0x193   : > { %v2487_v10 = vrot.slane %v2486_v2, 4  ;;  %v3233_v12 = vpop.f32.mrb[82].mxu1  ;;  %v1686_v13 = vpop.f32.mrb[83].mxu0 }
 0x194   : > { %v1895_v15 = vmax.f32 %v1893_v63, %v1894_v7  ;;  %v1900_v16 = vmax.f32 %v1683_v6, %v1686_v13  ;;  %v2279_v18 = vpop.f32.mrb[83].mxu1 }
 0x195   : > { %v2488_v59 = vmax.f32 %v2486_v2, %v2487_v10  ;;  %v2493_v62 = vmax.f32 %v2276_v8, %v2279_v18 }
 0x196   : > { %v1896_v3 = vrot.slane %v1895_v15, 2  ;;  %v1901_v19 = vmax.f32 %v1900_v16, %v3166_v0 }
 0x197   : > { %v2489_v20 = vrot.slane %v2488_v59, 2  ;;  %v2494_v21 = vmax.f32 %v2493_v62, %v3232_v4 }
 0x198   : > { %v1897_v22 = vmax.f32 %v1895_v15, %v1896_v3  ;;  %v3170_v23 = vpop.f32.mrb[84].mxu0  ;;  %v1902_v24 = vmax.f32 %v1901_v19, %v3167_v9 }
 0x199   : > { %v2490_v25 = vmax.f32 %v2488_v59, %v2489_v20  ;;  %v3236_v27 = vpop.f32.mrb[84].mxu1  ;;  %v1699_v28 = vpop.f32.mrb[85].mxu0  ;;  %v2495_v30 = vmax.f32 %v2494_v21, %v3233_v12 }
 0x19a   : > { %v1898_v31 = vrot.slane %v1897_v22, 1  ;;  %v1903_v33 = vmax.f32 %v1902_v24, %v1699_v28  ;;  %v2292_v34 = vpop.f32.mrb[85].mxu1  ;;  %v3171_v35 = vpop.f32.mrb[86].mxu0 }
 0x19b   : > { %v2491_v36 = vrot.slane %v2490_v25, 1  ;;  %v2496_v37 = vmax.f32 %v2495_v30, %v2292_v34  ;;  %v3237_v38 = vpop.f32.mrb[86].mxu1  ;;  %v1702_v40 = vpop.f32.mrb[87].mxu0 }
 0x19c   : > { %v1899_v41 = vmax.f32 %v1897_v22, %v1898_v31  ;;  %v1904_v45 = vmax.f32 %v1903_v33, %v1702_v40  ;;  %v2295_v48 = vpop.f32.mrb[87].mxu1 }
 0x19d   : > { %v2497_v53 = vmax.f32 %v2496_v37, %v2295_v48  ;;  %v2492_v56 = vmax.f32 %v2490_v25, %v2491_v36 }
 0x19e   : > { %v1979_v55 = vmax.f32 %v1386_v50, %v1899_v41  ;;  %v1905_v58 = vmax.f32 %v1904_v45, %v3170_v23 }
 0x19f   : > { %v2498_v63 = vmax.f32 %v2497_v53, %v3236_v27 }
 0x1a0   : > { %v2572_v0 = vmax.f32 %v1979_v55, %v2492_v56  ;;  %v1906_v2 = vmax.f32 %v1905_v58, %v3171_v35  ;;  %v3174_v4 = vpop.f32.mrb[88].mxu0 }
 0x1a1   : > { %v2499_v6 = vmax.f32 %v2498_v63, %v3237_v38  ;;  %v3240_v7 = vpop.f32.mrb[88].mxu1  ;;  %v1715_v8 = vpop.f32.mrb[89].mxu0 }
 0x1a2   : > { %v2592_v9 = vsel %vm2591_vm2, %v2572_v0, %v2571_v60  ;;  %v1907_v10 = vrot.slane %v1906_v2, 4  ;;  %v2308_v12 = vpop.f32.mrb[89].mxu1  ;;  %v3175_v13 = vpop.f32.mrb[90].mxu0 }
 0x1a3   : > { %v2500_v15 = vrot.slane %v2499_v6, 4  ;;  %v3241_v16 = vpop.f32.mrb[90].mxu1  ;;  %v1718_v18 = vpop.f32.mrb[91].mxu0 }
 0x1a4   : > { %v1908_v59 = vmax.f32 %v1906_v2, %v1907_v10  ;;  %v1913_v44 = vmax.f32 %v1715_v8, %v1718_v18  ;;  %v2311_v47 = vpop.f32.mrb[91].mxu1 }
 0x1a5   : > { %v2501_v50 = vmax.f32 %v2499_v6, %v2500_v15  ;;  %v2506_v62 = vmax.f32 %v2308_v12, %v2311_v47 }
 0x1a6   : > { %v1909_v3 = vrot.slane %v1908_v59, 2  ;;  %v1914_v19 = vmax.f32 %v1913_v44, %v3174_v4 }
 0x1a7   : > { %v2502_v20 = vrot.slane %v2501_v50, 2  ;;  %v2507_v21 = vmax.f32 %v2506_v62, %v3240_v7 }
 0x1a8   : > { %v1910_v22 = vmax.f32 %v1908_v59, %v1909_v3  ;;  %v3178_v23 = vpop.f32.mrb[92].mxu0  ;;  %v1915_v24 = vmax.f32 %v1914_v19, %v3175_v13 }
 0x1a9   : > { %v2503_v25 = vmax.f32 %v2501_v50, %v2502_v20  ;;  %v3244_v60 = vpop.f32.mrb[92].mxu1  ;;  %v1731_v27 = vpop.f32.mrb[93].mxu0  ;;  %v2508_v28 = vmax.f32 %v2507_v21, %v3241_v16 }
 0x1aa   : > { %v1911_v30 = vrot.slane %v1910_v22, 1  ;;  %v1916_v31 = vmax.f32 %v1915_v24, %v1731_v27  ;;  %v2324_v33 = vpop.f32.mrb[93].mxu1  ;;  %v3179_v34 = vpop.f32.mrb[94].mxu0 }
 0x1ab   : > { %v2504_v35 = vrot.slane %v2503_v25, 1  ;;  %v2509_v36 = vmax.f32 %v2508_v28, %v2324_v33  ;;  %v3245_v37 = vpop.f32.mrb[94].mxu1  ;;  %v1734_v38 = vpop.f32.mrb[95].mxu0 }
 0x1ac   : > { %v1912_v40 = vmax.f32 %v1910_v22, %v1911_v30  ;;  %v1917_v41 = vmax.f32 %v1916_v31, %v1734_v38  ;;  %v2327_v45 = vpop.f32.mrb[95].mxu1 }
 0x1ad   : > { %v2510_v48 = vmax.f32 %v2509_v36, %v2327_v45  ;;  %v2505_v55 = vmax.f32 %v2503_v25, %v2504_v35 }
 0x1ae   : > { %v1980_v53 = vmax.f32 %v1387_v32, %v1912_v40  ;;  %v1918_v56 = vmax.f32 %v1917_v41, %v3178_v23 }
 0x1af   : > { %v2511_v58 = vmax.f32 %v2510_v48, %v3244_v60 }
 0x1b0   : > { %v2573_v63 = vmax.f32 %v1980_v53, %v2505_v55  ;;  %v1919_v0 = vmax.f32 %v1918_v56, %v3179_v34  ;;  %v3182_v2 = vpop.f32.mrb[96].mxu0 }
 0x1b1   : > { %v2512_v4 = vmax.f32 %v2511_v58, %v3245_v37  ;;  %v3248_v6 = vpop.f32.mrb[96].mxu1  ;;  %v1747_v7 = vpop.f32.mrb[97].mxu0 }
 0x1b2   : > { %v2594_v8 = vsel %vm2593_vm3, %v2573_v63, %v2592_v9  ;;  %v1920_v10 = vrot.slane %v1919_v0, 4  ;;  %v2340_v12 = vpop.f32.mrb[97].mxu1  ;;  %v3183_v13 = vpop.f32.mrb[98].mxu0 }
 0x1b3   : > { %v2513_v15 = vrot.slane %v2512_v4, 4  ;;  %v3249_v16 = vpop.f32.mrb[98].mxu1  ;;  %v1750_v18 = vpop.f32.mrb[99].mxu0 }
 0x1b4   : > { %v1921_v59 = vmax.f32 %v1919_v0, %v1920_v10  ;;  %v1926_v26 = vmax.f32 %v1747_v7, %v1750_v18  ;;  %v2343_v29 = vpop.f32.mrb[99].mxu1 }
 0x1b5   : > { %v2514_v32 = vmax.f32 %v2512_v4, %v2513_v15  ;;  %v2519_v44 = vmax.f32 %v2340_v12, %v2343_v29 }
 0x1b6   : > { %v1922_v47 = vrot.slane %v1921_v59, 2  ;;  %v1927_v50 = vmax.f32 %v1926_v26, %v3182_v2 }
 0x1b7   : > { %v2515_v62 = vrot.slane %v2514_v32, 2  ;;  %v2520_v3 = vmax.f32 %v2519_v44, %v3248_v6 }
 0x1b8   : > { %v1923_v19 = vmax.f32 %v1921_v59, %v1922_v47  ;;  %v3186_v20 = vpop.f32.mrb[100].mxu0  ;;  %v1928_v21 = vmax.f32 %v1927_v50, %v3183_v13 }
 0x1b9   : > { %v2516_v22 = vmax.f32 %v2514_v32, %v2515_v62  ;;  %v3252_v9 = vpop.f32.mrb[100].mxu1  ;;  %v1763_v23 = vpop.f32.mrb[101].mxu0  ;;  %v2521_v24 = vmax.f32 %v2520_v3, %v3249_v16 }
 0x1ba   : > { %v1924_v25 = vrot.slane %v1923_v19, 1  ;;  %v1929_v60 = vmax.f32 %v1928_v21, %v1763_v23  ;;  %v2356_v27 = vpop.f32.mrb[101].mxu1  ;;  %v3187_v28 = vpop.f32.mrb[102].mxu0 }
 0x1bb   : > { %v2517_v30 = vrot.slane %v2516_v22, 1  ;;  %v2522_v31 = vmax.f32 %v2521_v24, %v2356_v27  ;;  %v3253_v33 = vpop.f32.mrb[102].mxu1  ;;  %v1766_v34 = vpop.f32.mrb[103].mxu0 }
 0x1bc   : > { %v1925_v35 = vmax.f32 %v1923_v19, %v1924_v25  ;;  %v1930_v36 = vmax.f32 %v1929_v60, %v1766_v34  ;;  %v2359_v37 = vpop.f32.mrb[103].mxu1 }
 0x1bd   : > { %v2523_v38 = vmax.f32 %v2522_v31, %v2359_v37  ;;  %v2518_v41 = vmax.f32 %v2516_v22, %v2517_v30 }
 0x1be   : > { %v1981_v40 = vmax.f32 %v1388_v17, %v1925_v35  ;;  %v1931_v45 = vmax.f32 %v1930_v36, %v3186_v20 }
 0x1bf   : > { %v2524_v48 = vmax.f32 %v2523_v38, %v3252_v9 }
 0x1c0   : > { %v2574_v53 = vmax.f32 %v1981_v40, %v2518_v41  ;;  %v1932_v55 = vmax.f32 %v1931_v45, %v3187_v28  ;;  %v3190_v56 = vpop.f32.mrb[104].mxu0 }
 0x1c1   : > { %v2525_v58 = vmax.f32 %v2524_v48, %v3253_v33  ;;  %v3256_v63 = vpop.f32.mrb[104].mxu1  ;;  %v1779_v0 = vpop.f32.mrb[105].mxu0 }
 0x1c2   : > { %v2596_v2 = vsel %vm2595_vm4, %v2574_v53, %v2594_v8  ;;  %v1933_v4 = vrot.slane %v1932_v55, 4  ;;  %v2372_v6 = vpop.f32.mrb[105].mxu1  ;;  %v3191_v7 = vpop.f32.mrb[106].mxu0 }
 0x1c3   : > { %v2526_v10 = vrot.slane %v2525_v58, 4  ;;  %v3257_v12 = vpop.f32.mrb[106].mxu1  ;;  %v1782_v13 = vpop.f32.mrb[107].mxu0 }
 0x1c4   : > { %v1934_v15 = vmax.f32 %v1932_v55, %v1933_v4  ;;  %v1939_v11 = vmax.f32 %v1779_v0, %v1782_v13  ;;  %v2375_v14 = vpop.f32.mrb[107].mxu1 }
 0x1c5   : > { %v2527_v17 = vmax.f32 %v2525_v58, %v2526_v10  ;;  %v2532_v16 = vmax.f32 %v2372_v6, %v2375_v14 }
 0x1c6   : > { %v1935_v18 = vrot.slane %v1934_v15, 2  ;;  %v1940_v59 = vmax.f32 %v1939_v11, %v3190_v56 }
 0x1c7   : > { %v2528_v26 = vrot.slane %v2527_v17, 2  ;;  %v2533_v29 = vmax.f32 %v2532_v16, %v3256_v63 }
 0x1c8   : > { %v1936_v32 = vmax.f32 %v1934_v15, %v1935_v18  ;;  %v3194_v44 = vpop.f32.mrb[108].mxu0  ;;  %v1941_v47 = vmax.f32 %v1940_v59, %v3191_v7 }
 0x1c9   : > { %v2529_v50 = vmax.f32 %v2527_v17, %v2528_v26  ;;  %v3260_v8 = vpop.f32.mrb[108].mxu1  ;;  %v1795_v62 = vpop.f32.mrb[109].mxu0  ;;  %v2534_v3 = vmax.f32 %v2533_v29, %v3257_v12 }
 0x1ca   : > { %v1937_v19 = vrot.slane %v1936_v32, 1  ;;  %v1942_v20 = vmax.f32 %v1941_v47, %v1795_v62  ;;  %v2388_v21 = vpop.f32.mrb[109].mxu1  ;;  %v3195_v22 = vpop.f32.mrb[110].mxu0 }
 0x1cb   : > { %v2530_v9 = vrot.slane %v2529_v50, 1  ;;  %v2535_v23 = vmax.f32 %v2534_v3, %v2388_v21  ;;  %v3261_v24 = vpop.f32.mrb[110].mxu1  ;;  %v1798_v25 = vpop.f32.mrb[111].mxu0 }
 0x1cc   : > { %v1938_v60 = vmax.f32 %v1936_v32, %v1937_v19  ;;  %v1943_v27 = vmax.f32 %v1942_v20, %v1798_v25  ;;  %v2391_v28 = vpop.f32.mrb[111].mxu1 }
 0x1cd   : > { %v2536_v30 = vmax.f32 %v2535_v23, %v2391_v28  ;;  %v2531_v33 = vmax.f32 %v2529_v50, %v2530_v9 }
 0x1ce   : > { %v1982_v31 = vmax.f32 %v1389_v5, %v1938_v60  ;;  %v1944_v34 = vmax.f32 %v1943_v27, %v3194_v44 }
 0x1cf   : > { %v2537_v35 = vmax.f32 %v2536_v30, %v3260_v8 }
 0x1d0   : > { %v2575_v36 = vmax.f32 %v1982_v31, %v2531_v33  ;;  %v1945_v37 = vmax.f32 %v1944_v34, %v3195_v22  ;;  %v3198_v38 = vpop.f32.mrb[112].mxu0 }
 0x1d1   : > { %v2538_v40 = vmax.f32 %v2537_v35, %v3261_v24  ;;  %v3264_v41 = vpop.f32.mrb[112].mxu1  ;;  %v1811_v45 = vpop.f32.mrb[113].mxu0 }
 0x1d2   : > { %v1946_v48 = vrot.slane %v1945_v37, 4  ;;  %v2404_v53 = vpop.f32.mrb[113].mxu1  ;;  %v3199_v55 = vpop.f32.mrb[114].mxu0  ;;  %v2598_v56 = vsel %vm2597_vm5, %v2575_v36, %v2596_v2 }
 0x1d3   : > { %v2539_v58 = vrot.slane %v2538_v40, 4  ;;  %v3265_v63 = vpop.f32.mrb[114].mxu1  ;;  %v1814_v0 = vpop.f32.mrb[115].mxu0 }
 0x1d4   : > { %v1947_v4 = vmax.f32 %v1945_v37, %v1946_v48  ;;  %v1952_v61 = vmax.f32 %v1811_v45, %v1814_v0  ;;  %v2407_v1 = vpop.f32.mrb[115].mxu1 }
 0x1d5   : > { %v2540_v5 = vmax.f32 %v2538_v40, %v2539_v58  ;;  %v2545_v6 = vmax.f32 %v2404_v53, %v2407_v1 }
 0x1d6   : > { %v1948_v7 = vrot.slane %v1947_v4, 2  ;;  %v1953_v10 = vmax.f32 %v1952_v61, %v3198_v38 }
 0x1d7   : > { %v2541_v12 = vrot.slane %v2540_v5, 2  ;;  %v2546_v13 = vmax.f32 %v2545_v6, %v3264_v41 }
 0x1d8   : > { %v1949_v15 = vmax.f32 %v1947_v4, %v1948_v7  ;;  %v3202_v11 = vpop.f32.mrb[116].mxu0  ;;  %v1954_v14 = vmax.f32 %v1953_v10, %v3199_v55 }
 0x1d9   : > { %v2542_v17 = vmax.f32 %v2540_v5, %v2541_v12  ;;  %v3268_v16 = vpop.f32.mrb[116].mxu1  ;;  %v1827_v18 = vpop.f32.mrb[117].mxu0  ;;  %v2547_v59 = vmax.f32 %v2546_v13, %v3265_v63 }
 0x1da   : > { %v1950_v2 = vrot.slane %v1949_v15, 1  ;;  %v1955_v26 = vmax.f32 %v1954_v14, %v1827_v18  ;;  %v2420_v29 = vpop.f32.mrb[117].mxu1  ;;  %v3203_v32 = vpop.f32.mrb[118].mxu0 }
 0x1db   : > { %v2543_v44 = vrot.slane %v2542_v17, 1  ;;  %v2548_v47 = vmax.f32 %v2547_v59, %v2420_v29  ;;  %v3269_v50 = vpop.f32.mrb[118].mxu1  ;;  %v1830_v8 = vpop.f32.mrb[119].mxu0 }
 0x1dc   : > { %v1951_v62 = vmax.f32 %v1949_v15, %v1950_v2  ;;  %v1956_v3 = vmax.f32 %v1955_v26, %v1830_v8  ;;  %v2423_v19 = vpop.f32.mrb[119].mxu1 }
 0x1dd   : > { %v2549_v20 = vmax.f32 %v2548_v47, %v2423_v19  ;;  %v2544_v22 = vmax.f32 %v2542_v17, %v2543_v44 }
 0x1de   : > { %v1983_v21 = vmax.f32 %v1390_v57, %v1951_v62  ;;  %v1957_v9 = vmax.f32 %v1956_v3, %v3202_v11 }
 0x1df   : > { %v2550_v23 = vmax.f32 %v2549_v20, %v3268_v16 }
 0x1e0   : > { %v2576_v24 = vmax.f32 %v1983_v21, %v2544_v22  ;;  %v1958_v25 = vmax.f32 %v1957_v9, %v3203_v32  ;;  %v3206_v60 = vpop.f32.mrb[120].mxu0 }
 0x1e1   : > { %v2551_v27 = vmax.f32 %v2550_v23, %v3269_v50  ;;  %v3272_v28 = vpop.f32.mrb[120].mxu1  ;;  %v1843_v30 = vpop.f32.mrb[121].mxu0 }
 0x1e2   : > { %v1959_v31 = vrot.slane %v1958_v25, 4  ;;  %v2436_v33 = vpop.f32.mrb[121].mxu1  ;;  %v3207_v34 = vpop.f32.mrb[122].mxu0  ;;  %v2600_v35 = vsel %vm2599_vm6, %v2576_v24, %v2598_v56 }
 0x1e3   : > { %v2552_v36 = vrot.slane %v2551_v27, 4  ;;  %v3273_v37 = vpop.f32.mrb[122].mxu1  ;;  %v1846_v38 = vpop.f32.mrb[123].mxu0 }
 0x1e4   : > { %v1960_v40 = vmax.f32 %v1958_v25, %v1959_v31  ;;  %v1965_v51 = vmax.f32 %v1843_v30, %v1846_v38  ;;  %v2439_v54 = vpop.f32.mrb[123].mxu1 }
 0x1e5   : > { %v2553_v57 = vmax.f32 %v2551_v27, %v2552_v36  ;;  %v2558_v41 = vmax.f32 %v2436_v33, %v2439_v54 }
 0x1e6   : > { %v1961_v45 = vrot.slane %v1960_v40, 2  ;;  %v1966_v48 = vmax.f32 %v1965_v51, %v3206_v60  ;;  %v2876_v60 = vld [vmem:[%s4016_s2] ss:$0 sm:$0xff] }
 0x1e7   : > { %v2554_v53 = vrot.slane %v2553_v57, 2  ;;  %v2559_v55 = vmax.f32 %v2558_v41, %v3272_v28 }
 0x1e8   : > { %v1962_v58 = vmax.f32 %v1960_v40, %v1961_v45  ;;  %v3210_v63 = vpop.f32.mrb[124].mxu0  ;;  %v1967_v0 = vmax.f32 %v1966_v48, %v3207_v34 }
 0x1e9   : > { %v2555_v4 = vmax.f32 %v2553_v57, %v2554_v53  ;;  %v3276_v61 = vpop.f32.mrb[124].mxu1  ;;  %v1859_v1 = vpop.f32.mrb[125].mxu0  ;;  %v2560_v5 = vmax.f32 %v2559_v55, %v3273_v37 }
 0x1ea   : > { %v1963_v56 = vrot.slane %v1962_v58, 1  ;;  %v1968_v6 = vmax.f32 %v1967_v0, %v1859_v1  ;;  %v2452_v7 = vpop.f32.mrb[125].mxu1  ;;  %v3211_v10 = vpop.f32.mrb[126].mxu0 }
 0x1eb   : > { %v2556_v12 = vrot.slane %v2555_v4, 1  ;;  %v2561_v13 = vmax.f32 %v2560_v5, %v2452_v7  ;;  %v3277_v15 = vpop.f32.mrb[126].mxu1  ;;  %v1862_v11 = vpop.f32.mrb[127].mxu0 }
 0x1ec   : > { %v1964_v14 = vmax.f32 %v1962_v58, %v1963_v56  ;;  %v1969_v17 = vmax.f32 %v1968_v6, %v1862_v11  ;;  %v2455_v16 = vpop.f32.mrb[127].mxu1 }
 0x1ed   : > { %v2562_v18 = vmax.f32 %v2561_v13, %v2455_v16  ;;  %v2557_v2 = vmax.f32 %v2555_v4, %v2556_v12 }
 0x1ee   : > { %v1984_v59 = vmax.f32 %v1391_v52, %v1964_v14  ;;  %v1970_v26 = vmax.f32 %v1969_v17, %v3210_v63 }
 0x1ef   : > { %v2563_v29 = vmax.f32 %v2562_v18, %v3276_v61 }
 0x1f0   : > { %v2577_v32 = vmax.f32 %v1984_v59, %v2557_v2  ;;  %v1971_v44 = vmax.f32 %v1970_v26, %v3211_v10 }
 0x1f1   : > { %v2564_v47 = vmax.f32 %v2563_v29, %v3277_v15 }
 0x1f2   : > { %v1972_v50 = vrot.slane %v1971_v44, 4  ;;  %v2602_v8 = vsel %vm2601_vm7, %v2577_v32, %v2600_v35 }
 0x1f3   : > { %v2565_v62 = vrot.slane %v2564_v47, 4 }
 0x1f4   : > { %v1973_v3 = vmax.f32 %v1971_v44, %v1972_v50 }
 0x1f5   : > { %v2566_v19 = vmax.f32 %v2564_v47, %v2565_v62 }
 0x1f6   : > { %v1974_v20 = vrot.slane %v1973_v3, 2 }
 0x1f7   : > { %v2567_v21 = vrot.slane %v2566_v19, 2 }
 0x1f8   : > { %v1975_v22 = vmax.f32 %v1973_v3, %v1974_v20 }
 0x1f9   : > { %v2568_v9 = vmax.f32 %v2566_v19, %v2567_v21 }
 0x1fa   : > { %v1976_v42 = vrot.slane %v1975_v22, 1 }
 0x1fb   : > { %v2569_v46 = vrot.slane %v2568_v9, 1 }
 0x1fc   : > { %v1977_v52 = vmax.f32 %v1975_v22, %v1976_v42 }
 0x1fd   : > { %v2570_v24 = vmax.f32 %v2568_v9, %v2569_v46 }
 0x1fe   : > { %v1985_v23 = vmax.f32 %v1392_v49, %v1977_v52 }
 0x200   : > { %v2578_v25 = vmax.f32 %v1985_v23, %v2570_v24 }
 0x202   : > { %v2604_v27 = vsel %vm2603_vm8, %v2578_v25, %v2602_v8 }
 0x203   : > { %v2648_v28 = vadd.f32 %v2876_v60, %v2604_v27 }
 0x205   : > { %v2649_v30 = vmax.f32 %v2648_v28, 0.0 }
 0x207   : > { %2650 = vst [vmem:[%s189_s11] sm:$0xff] %v2649_v30 }
 0x208   : > { %3351 = shalt.err (!%p3348_p5)
}
 0x209   : > { %s3352_s30 = scalar_lea.hbm %s3967_s23, 128  ;;  %s3356_s6 = scalar_lea.hbm %s4017_s3, 256 }
 0x20a   : > { %p3353_p6 = scmp.ne.s32.totalorder %s3967_s23, %s3352_s30  ;;  %p3357_p10 = scmp.lt.u32.totalorder %s3967_s23, %s4017_s3 }
 0x20b   : > { %p3358_p11 = scmp.lt.u32.totalorder %s3356_s6, %s3352_s30  ;;  %p3360_p13 = scmp.lt.u32.totalorder %s3352_s30, %s3967_s23 }
 0x20c   : > { %p3354_p7 = pnand %p3353_p6, %p3479_p4 }
 0x20d   : > { %p3359_p12 = por %p3358_p11, %p3357_p10 }
 0x20e   : > { %p3355_p9 = pneg %p3354_p7 }
 0x20f   : > { %p3361_p0 = por %p3360_p13, %p3359_p12 }
 0x211   : > { %p3362_p1 = pnand %p3361_p0, %p3355_p9 }
 0x213   : > { %3365 = shalt.err (!%p3362_p1)
}
 0x214   : > { %3282 = dma.vmem_to_hbm [thread:$0]  (%p3479_p4), %s3969_s18, 128, %s3967_s23, %s2652_s26  }
 0x215 PF: > { %p3288_p2 = scmp.ge.s32.totalorder %s3416_s17, 2  ;;  %s2677_s9 = sand.u32 1, %s3396_s12  }
 0x216   : > { %s2678_s10 = scalar_lea.sflag [#allocation3], %s2677_s9 }
 0x217   : > { %p3285_p3 = pnand %p3288_p2, %p3486_p8 }
 0x219   : > { %3391 = dma.done.wait (!%p3285_p3), %s2678_s10, 128  }
 0x21a   : > { %3393 = vsyncadd (!%p3285_p3), %s2678_s10, 4294967168  ;;  %s16_s17 = sadd.s32 1, %s3416_s17   ;;  %s4020_s12 = smov %s3400_s13 }
 0x21b   : > { %p13_p5 = scmp.ge.s32.totalorder %s16_s17, 4   ;;  %s4021_s13 = smov %s3404_s14 }
 0x21c   : > { %s4022_s14 = smov %s3492_s25  ;;  %s4023_s15 = smov %s3412_s16 }
 0x21d   : > { %s4024_s16 = smov %s4026_s20  ;;  %15 = sbr.rel (!%p13_p5) target bundleno = 4 (0x4), region = 79 }
 0x224   :  { %2683 = vsyncpa [#allocation3], 1 }
 0x225   :  { %2685 = vsyncpa [#allocation3 + $0x1], 1 }

</bundles_post_ra>
